<compile_context>
chip_gen: v5e
topology: v5e:2x2
jax: 0.10.0
libtpu: 0.0.40
codegen_flags: <defaults>
</compile_context>

<pallas_src>
import math

import jax
import jax.numpy as jnp
from jax.experimental import pallas as pl
from jax.experimental.pallas import tpu as pltpu


# ---------------------------------------------------------------------------
# Coordinate augmentation: (B, N, 3) -> (B, 8, N) channel-first, such that
#   query_aug[:, q] . source_aug[:, s] == ||p_q - p_s||^2
# ---------------------------------------------------------------------------
def _augment_coords(p, role):
    p = p.astype(jnp.float32)
    x = jnp.swapaxes(p, 1, 2)                       # (B, 3, N)
    sq = jnp.sum(x * x, axis=1, keepdims=True)      # (B, 1, N)
    ones = jnp.ones_like(sq)                        # (B, 1, N)
    zeros = jnp.zeros_like(x)                       # (B, 3, N)
    if role == "query":
        return jnp.concatenate([x, sq, ones, zeros], axis=1)       # (B, 8, N)
    else:  # source
        return jnp.concatenate([-2.0 * x, ones, sq, zeros], axis=1)  # (B, 8, N)


# ---------------------------------------------------------------------------
# Fused FeaturePropogation stage kernel (one (batch, N1-tile) grid point):
#   p1: (1, 8,  TN1) f32   augmented dense/query coords (tile)
#   p2: (1, 8,  N2 ) f32   augmented coarse/source coords (resident)
#   f2: (1, C2, N2 ) bf16  coarse features (resident)
#   f1: (1, C1, TN1) bf16  skip features (tile)
#   w1_skip (Cm, C1), w1_interp (Cm, C2) bf16, b1 (Cm, 1) f32
#   [w_l (Co, Ci) bf16, b_l (Co, 1) f32] * n_extra
#   out: (1, Cout, TN1) bf16
# ---------------------------------------------------------------------------
def _make_fused_fp_kernel(n_extra):
    def kernel(*refs):
        p1_ref, p2_ref, f2_ref, f1_ref, wskip_ref, winterp_ref, b1_ref = refs[:7]
        extra_refs = refs[7:7 + 2 * n_extra]
        out_ref = refs[7 + 2 * n_extra]

        # --- squared distances via a single K=8 MXU matmul ------------------
        p1 = p1_ref[0]                                     # (8, TN1) f32
        p2 = p2_ref[0]                                     # (8, N2)  f32
        p1t = jnp.transpose(p1)                            # (TN1, 8) small relayout
        d2 = jnp.dot(p1t, p2, preferred_element_type=jnp.float32)   # (TN1, N2)
        d2 = jnp.maximum(d2, 0.0)

        # --- 3-NN selection + inverse-distance weight matrix ----------------
        n2 = d2.shape[1]
        col = jax.lax.broadcasted_iota(jnp.int32, d2.shape, 1)
        big = jnp.float32(1e30)
        wmat = jnp.zeros(d2.shape, jnp.float32)
        dwork = d2
        for _ in range(3):
            dmin = jnp.min(dwork, axis=-1, keepdims=True)                  # (TN1, 1)
            idx = jnp.min(jnp.where(dwork <= dmin, col, n2), axis=-1,
                          keepdims=True)                                   # first argmin
            onehot = col == idx
            wmat = wmat + jnp.where(onehot, 1.0 / (dmin + 1e-8), 0.0)
            dwork = jnp.where(onehot, big, dwork)
        wmat = wmat / jnp.sum(wmat, axis=-1, keepdims=True)                # (TN1, N2)

        # --- interpolation: contract wmat's N2 axis (no transpose) ----------
        f2 = f2_ref[0]                                     # (C2, N2) bf16
        interp = jax.lax.dot_general(
            f2, wmat.astype(jnp.bfloat16),
            (((1,), (1,)), ((), ())),
            preferred_element_type=jnp.float32)            # (C2, TN1) f32

        # --- conv1 with implicit concat: W1_skip@f1 + W1_interp@interp ------
        f1 = f1_ref[0]                                     # (C1, TN1) bf16
        acc = jnp.dot(wskip_ref[...], f1, preferred_element_type=jnp.float32)
        acc = acc + jnp.dot(winterp_ref[...], interp.astype(jnp.bfloat16),
                            preferred_element_type=jnp.float32)
        acc = acc + b1_ref[...]
        x = jnp.maximum(acc, 0.0).astype(jnp.bfloat16)     # (Cm, TN1)

        # --- remaining conv+BN+ReLU layers ----------------------------------
        for l in range(n_extra):
            w = extra_refs[2 * l][...]
            b = extra_refs[2 * l + 1][...]
            y = jnp.dot(w, x, preferred_element_type=jnp.float32) + b
            x = jnp.maximum(y, 0.0).astype(jnp.bfloat16)

        out_ref[0] = x.astype(out_ref.dtype)

    return kernel


def _choose_tile_n1(n1, n2):
    """Largest N1 tile (multiple of 128, capped) keeping (TN1,N2) temporaries small."""
    if n1 <= 128:
        return n1
    budget = (24 * 1024 * 1024) // (6 * 4 * max(n2, 1))   # ~6 f32 (TN1,N2) temporaries
    tn1 = max(128, min(512, (budget // 128) * 128))
    n1_up = ((n1 + 127) // 128) * 128
    return min(tn1, n1_up)


def fused_fp_stage(p1_aug, p2_aug, f1, f2, params):
    """One FeaturePropogation stage.

    p1_aug: (B, 8, N1) f32, p2_aug: (B, 8, N2) f32,
    f1: (B, C1, N1) skip features, f2: (B, C2, N2) coarse features.
    Returns (B, Cout, N1) bf16.
    """
    B, _, N1 = p1_aug.shape
    _, _, N2 = p2_aug.shape
    C1 = f1.shape[1]
    C2 = f2.shape[1]

    w_skip = params["w1_skip"]
    w_interp = params["w1_interp"]
    b1 = params["b1"]
    extra = params["extra"]
    Cout = extra[-1][0].shape[0] if extra else w_skip.shape[0]

    f1 = f1.astype(jnp.bfloat16)
    f2 = f2.astype(jnp.bfloat16)

    tn1 = _choose_tile_n1(N1, N2)
    n1p = ((N1 + tn1 - 1) // tn1) * tn1
    if n1p != N1:
        p1_aug = jnp.pad(p1_aug, ((0, 0), (0, 0), (0, n1p - N1)))
        f1 = jnp.pad(f1, ((0, 0), (0, 0), (0, n1p - N1)))

    grid = (B, n1p // tn1)

    in_specs = [
        pl.BlockSpec((1, 8, tn1), lambda b, t: (b, 0, t)),       # p1 tile
        pl.BlockSpec((1, 8, N2), lambda b, t: (b, 0, 0)),        # p2 resident
        pl.BlockSpec((1, C2, N2), lambda b, t: (b, 0, 0)),       # f2 resident
        pl.BlockSpec((1, C1, tn1), lambda b, t: (b, 0, t)),      # f1 tile
        pl.BlockSpec(tuple(w_skip.shape), lambda b, t: (0, 0)),
        pl.BlockSpec(tuple(w_interp.shape), lambda b, t: (0, 0)),
        pl.BlockSpec(tuple(b1.shape), lambda b, t: (0, 0)),
    ]
    args = [p1_aug, p2_aug, f2, f1, w_skip, w_interp, b1]
    for (w, b) in extra:
        in_specs.append(pl.BlockSpec(tuple(w.shape), lambda b_, t_: (0, 0)))
        in_specs.append(pl.BlockSpec(tuple(b.shape), lambda b_, t_: (0, 0)))
        args.append(w)
        args.append(b)

    out = pl.pallas_call(
        _make_fused_fp_kernel(len(extra)),
        out_shape=jax.ShapeDtypeStruct((B, Cout, n1p), jnp.bfloat16),
        grid=grid,
        in_specs=in_specs,
        out_specs=pl.BlockSpec((1, Cout, tn1), lambda b, t: (b, 0, t)),
        compiler_params=pltpu.CompilerParams(
            dimension_semantics=("parallel", "parallel"),
            vmem_limit_bytes=64 * 1024 * 1024,
        ),
    )(*args)

    if n1p != N1:
        out = out[:, :, :N1]
    return out


# ---------------------------------------------------------------------------
# Parameter construction mirroring PointNextDecoder_SAMBLE.__init__
# (BN folded into the 1x1 conv; first-layer weight split for implicit concat)
# ---------------------------------------------------------------------------
def init_decoder_params(key, encoder_channel_list, decoder_layers=2,
                        decoder_stages=2, in_channels_pts=3, bn_eps=1e-5):
    in_channels = encoder_channel_list[-1]
    skip_channels = list(encoder_channel_list[:-1])
    if len(skip_channels) < decoder_stages:
        skip_channels.insert(0, in_channels_pts)
    fp_channels = list(encoder_channel_list[:decoder_stages])
    n_stages = len(fp_channels)

    stages = [None] * n_stages
    for i in range(-1, -n_stages - 1, -1):
        c_skip = skip_channels[i]
        mlp = [c_skip + in_channels] + [fp_channels[i]] * decoder_layers
        layers = []
        for j in range(len(mlp) - 1):
            cin, cout = mlp[j], mlp[j + 1]
            key, kw = jax.random.split(key)
            # Conv1d(k=1, bias=False) weight, deterministic Kaiming-ish init.
            w = jax.random.normal(kw, (cout, cin), jnp.float32) * (1.0 / math.sqrt(cin))
            # BatchNorm1d (inference): gamma=1, beta=0, mean=0, var=1 -> fold.
            gamma = jnp.ones((cout,), jnp.float32)
            beta = jnp.zeros((cout,), jnp.float32)
            rmean = jnp.zeros((cout,), jnp.float32)
            rvar = jnp.ones((cout,), jnp.float32)
            scale = gamma / jnp.sqrt(rvar + bn_eps)
            w_eff = (w * scale[:, None]).astype(jnp.bfloat16)
            b_eff = (beta - rmean * scale)[:, None].astype(jnp.float32)  # (Cout, 1)
            layers.append((w_eff, b_eff))
        w1, b1 = layers[0]
        stages[i] = {
            "w1_skip": w1[:, :c_skip],        # applies to skip features (cat first)
            "w1_interp": w1[:, c_skip:],      # applies to interpolated features
            "b1": b1,
            "extra": layers[1:],
        }
        in_channels = fp_channels[i]
    return stages


# ---------------------------------------------------------------------------
# Decoder forward (mirrors PointNextDecoder_SAMBLE.forward)
# ---------------------------------------------------------------------------
def pointnext_decoder_samble_forward(p, f, stages):
    n = len(stages)
    f = [jnp.asarray(fi).astype(jnp.bfloat16) for fi in f]
    for i in range(-1, -n - 1, -1):
        p1_aug = _augment_coords(p[i - 1], "query")    # dense level
        p2_aug = _augment_coords(p[i], "source")       # coarse level
        f[i - 1] = fused_fp_stage(p1_aug, p2_aug, f[i - 1], f[i], stages[i])
    return f[-n - 1].astype(jnp.float32)


# ---------------------------------------------------------------------------
# Example / smoke test
# ---------------------------------------------------------------------------
if __name__ == "__main__":
    key = jax.random.PRNGKey(0)

    # Small config: encoder with 3 levels, 2 decoder stages.
    encoder_channel_list = [16, 32, 64]
    decoder_stages = 2
    decoder_layers = 2
    B = 2
    Ns = [64, 32, 16]                      # points per level (dense -> coarse)
    Cs = encoder_channel_list              # feature channels per level

    keys = jax.random.split(key, 1 + 2 * len(Ns))
    pkey = keys[0]
    p = []
    f = []
    for lvl in range(len(Ns)):
        p.append(jax.random.uniform(keys[1 + 2 * lvl], (B, Ns[lvl], 3), jnp.float32))
        f.append(jax.random.normal(keys[2 + 2 * lvl], (B, Cs[lvl], Ns[lvl]), jnp.float32))

    stages = init_decoder_params(pkey, encoder_channel_list,
                                 decoder_layers=decoder_layers,
                                 decoder_stages=decoder_stages)

    out = pointnext_decoder_samble_forward(p, f, stages)
    out = jax.block_until_ready(out)

    expected_channels = encoder_channel_list[0]
    assert out.shape == (B, expected_channels, Ns[0]), out.shape
    assert bool(jnp.all(jnp.isfinite(out)))
    print("KERNEL_OK")
</pallas_src>

<mosaic_0001>
module attributes {stable_mosaic.version = 11 : i64} {
  func.func @kernel(%arg0: i32, %arg1: i32, %arg2: memref<1x8x32xf32, #tpu.memory_space<vmem>>, %arg3: memref<1x8x16xf32, #tpu.memory_space<vmem>>, %arg4: memref<1x64x16xbf16, #tpu.memory_space<vmem>>, %arg5: memref<1x32x32xbf16, #tpu.memory_space<vmem>>, %arg6: memref<32x32xbf16, #tpu.memory_space<vmem>>, %arg7: memref<32x64xbf16, #tpu.memory_space<vmem>>, %arg8: memref<32x1xf32, #tpu.memory_space<vmem>>, %arg9: memref<32x32xbf16, #tpu.memory_space<vmem>>, %arg10: memref<32x1xf32, #tpu.memory_space<vmem>>, %arg11: memref<1x32x32xbf16, #tpu.memory_space<vmem>>) attributes {dimension_semantics = [#tpu.dimension_semantics<parallel>, #tpu.dimension_semantics<parallel>], iteration_bounds = array<i64: 2, 1>, scalar_prefetch = 0 : i64, scratch_operands = 0 : i64, tpu.core_type = #tpu.core_type<tc>, window_params = [{transform_indices = @transform_0, window_bounds = array<i64: 1, 8, 32>}, {transform_indices = @transform_1, window_bounds = array<i64: 1, 8, 16>}, {transform_indices = @transform_2, window_bounds = array<i64: 1, 64, 16>}, {transform_indices = @transform_3, window_bounds = array<i64: 1, 32, 32>}, {pipeline_mode = #tpu.pipeline_mode<synchronous>, transform_indices = @transform_4, window_bounds = array<i64: 32, 32>}, {pipeline_mode = #tpu.pipeline_mode<synchronous>, transform_indices = @transform_5, window_bounds = array<i64: 32, 64>}, {pipeline_mode = #tpu.pipeline_mode<synchronous>, transform_indices = @transform_6, window_bounds = array<i64: 32, 1>}, {pipeline_mode = #tpu.pipeline_mode<synchronous>, transform_indices = @transform_7, window_bounds = array<i64: 32, 32>}, {pipeline_mode = #tpu.pipeline_mode<synchronous>, transform_indices = @transform_8, window_bounds = array<i64: 32, 1>}, {transform_indices = @transform_9, window_bounds = array<i64: 1, 32, 32>}]} {
    %c0 = arith.constant 0 : index
    %c0_0 = arith.constant 0 : index
    %c0_1 = arith.constant 0 : index
    %0 = vector.load %arg2[%c0, %c0_0, %c0_1] : memref<1x8x32xf32, #tpu.memory_space<vmem>>, vector<1x8x32xf32>
    %1 = vector.shape_cast %0 : vector<1x8x32xf32> to vector<8x32xf32>
    %c0_2 = arith.constant 0 : index
    %c0_3 = arith.constant 0 : index
    %c0_4 = arith.constant 0 : index
    %2 = vector.load %arg3[%c0_2, %c0_3, %c0_4] : memref<1x8x16xf32, #tpu.memory_space<vmem>>, vector<1x8x16xf32>
    %3 = vector.shape_cast %2 : vector<1x8x16xf32> to vector<8x16xf32>
    %4 = tpu.transpose %1, [1, 0] : vector<8x32xf32> -> vector<32x8xf32>
    %cst = arith.constant dense<0.000000e+00> : vector<32x16xf32>
    %5 = tpu.matmul %4, %3, %cst {dimension_numbers = #tpu.dot_dimension_numbers<[1], [0], [0], [1], [0, 0, 1, 1], [], []>} : vector<32x8xf32>, vector<8x16xf32>, vector<32x16xf32> -> vector<32x16xf32>
    %cst_5 = arith.constant 0.000000e+00 : f32
    %6 = vector.broadcast %cst_5 : f32 to vector<32x16xf32>
    %7 = arith.maximumf %5, %6 : vector<32x16xf32>
    %8 = tpu.iota {dimensions = array<i32: 1>} : vector<32x16xi32>
    %cst_6 = arith.constant 0.000000e+00 : f32
    %9 = vector.broadcast %cst_6 : f32 to vector<32x16xf32>
    %cst_7 = arith.constant dense<0x7F800000> : vector<32xf32>
    %10 = vector.multi_reduction <minimumf>, %7, %cst_7 [1] : vector<32x16xf32> to vector<32xf32>
    %11 = vector.shape_cast %10 : vector<32xf32> to vector<32x1xf32>
    %12 = vector.broadcast %11 : vector<32x1xf32> to vector<32x16xf32>
    %13 = arith.cmpf ole, %7, %12 : vector<32x16xf32>
    %c16_i32 = arith.constant 16 : i32
    %14 = vector.broadcast %c16_i32 : i32 to vector<32x16xi32>
    %15 = arith.select %13, %8, %14 : vector<32x16xi1>, vector<32x16xi32>
    %cst_8 = arith.constant dense<2147483647> : vector<32xi32>
    %16 = vector.multi_reduction <minsi>, %15, %cst_8 [1] : vector<32x16xi32> to vector<32xi32>
    %17 = vector.shape_cast %16 : vector<32xi32> to vector<32x1xi32>
    %18 = vector.broadcast %17 : vector<32x1xi32> to vector<32x16xi32>
    %19 = arith.cmpi eq, %8, %18 : vector<32x16xi32>
    %cst_9 = arith.constant 9.99999993E-9 : f32
    %20 = vector.broadcast %cst_9 : f32 to vector<32x1xf32>
    %21 = arith.addf %11, %20 : vector<32x1xf32>
    %cst_10 = arith.constant 1.000000e+00 : f32
    %22 = vector.broadcast %cst_10 : f32 to vector<32x1xf32>
    %23 = arith.divf %22, %21 : vector<32x1xf32>
    %cst_11 = arith.constant 0.000000e+00 : f32
    %24 = vector.shape_cast %23 : vector<32x1xf32> to vector<32x1xf32>
    %25 = vector.broadcast %24 : vector<32x1xf32> to vector<32x16xf32>
    %26 = vector.broadcast %cst_11 : f32 to vector<32x16xf32>
    %27 = arith.select %19, %25, %26 : vector<32x16xi1>, vector<32x16xf32>
    %28 = arith.addf %9, %27 : vector<32x16xf32>
    %cst_12 = arith.constant 1.000000e+30 : f32
    %29 = vector.broadcast %cst_12 : f32 to vector<32x16xf32>
    %30 = arith.select %19, %29, %7 : vector<32x16xi1>, vector<32x16xf32>
    %cst_13 = arith.constant dense<0x7F800000> : vector<32xf32>
    %31 = vector.multi_reduction <minimumf>, %30, %cst_13 [1] : vector<32x16xf32> to vector<32xf32>
    %32 = vector.shape_cast %31 : vector<32xf32> to vector<32x1xf32>
    %33 = vector.broadcast %32 : vector<32x1xf32> to vector<32x16xf32>
    %34 = arith.cmpf ole, %30, %33 : vector<32x16xf32>
    %c16_i32_14 = arith.constant 16 : i32
    %35 = vector.broadcast %c16_i32_14 : i32 to vector<32x16xi32>
    %36 = arith.select %34, %8, %35 : vector<32x16xi1>, vector<32x16xi32>
    %cst_15 = arith.constant dense<2147483647> : vector<32xi32>
    %37 = vector.multi_reduction <minsi>, %36, %cst_15 [1] : vector<32x16xi32> to vector<32xi32>
    %38 = vector.shape_cast %37 : vector<32xi32> to vector<32x1xi32>
    %39 = vector.broadcast %38 : vector<32x1xi32> to vector<32x16xi32>
    %40 = arith.cmpi eq, %8, %39 : vector<32x16xi32>
    %cst_16 = arith.constant 9.99999993E-9 : f32
    %41 = vector.broadcast %cst_16 : f32 to vector<32x1xf32>
    %42 = arith.addf %32, %41 : vector<32x1xf32>
    %cst_17 = arith.constant 1.000000e+00 : f32
    %43 = vector.broadcast %cst_17 : f32 to vector<32x1xf32>
    %44 = arith.divf %43, %42 : vector<32x1xf32>
    %cst_18 = arith.constant 0.000000e+00 : f32
    %45 = vector.shape_cast %44 : vector<32x1xf32> to vector<32x1xf32>
    %46 = vector.broadcast %45 : vector<32x1xf32> to vector<32x16xf32>
    %47 = vector.broadcast %cst_18 : f32 to vector<32x16xf32>
    %48 = arith.select %40, %46, %47 : vector<32x16xi1>, vector<32x16xf32>
    %49 = arith.addf %28, %48 : vector<32x16xf32>
    %cst_19 = arith.constant 1.000000e+30 : f32
    %50 = vector.broadcast %cst_19 : f32 to vector<32x16xf32>
    %51 = arith.select %40, %50, %30 : vector<32x16xi1>, vector<32x16xf32>
    %cst_20 = arith.constant dense<0x7F800000> : vector<32xf32>
    %52 = vector.multi_reduction <minimumf>, %51, %cst_20 [1] : vector<32x16xf32> to vector<32xf32>
    %53 = vector.shape_cast %52 : vector<32xf32> to vector<32x1xf32>
    %54 = vector.broadcast %53 : vector<32x1xf32> to vector<32x16xf32>
    %55 = arith.cmpf ole, %51, %54 : vector<32x16xf32>
    %c16_i32_21 = arith.constant 16 : i32
    %56 = vector.broadcast %c16_i32_21 : i32 to vector<32x16xi32>
    %57 = arith.select %55, %8, %56 : vector<32x16xi1>, vector<32x16xi32>
    %cst_22 = arith.constant dense<2147483647> : vector<32xi32>
    %58 = vector.multi_reduction <minsi>, %57, %cst_22 [1] : vector<32x16xi32> to vector<32xi32>
    %59 = vector.shape_cast %58 : vector<32xi32> to vector<32x1xi32>
    %60 = vector.broadcast %59 : vector<32x1xi32> to vector<32x16xi32>
    %61 = arith.cmpi eq, %8, %60 : vector<32x16xi32>
    %cst_23 = arith.constant 9.99999993E-9 : f32
    %62 = vector.broadcast %cst_23 : f32 to vector<32x1xf32>
    %63 = arith.addf %53, %62 : vector<32x1xf32>
    %cst_24 = arith.constant 1.000000e+00 : f32
    %64 = vector.broadcast %cst_24 : f32 to vector<32x1xf32>
    %65 = arith.divf %64, %63 : vector<32x1xf32>
    %cst_25 = arith.constant 0.000000e+00 : f32
    %66 = vector.shape_cast %65 : vector<32x1xf32> to vector<32x1xf32>
    %67 = vector.broadcast %66 : vector<32x1xf32> to vector<32x16xf32>
    %68 = vector.broadcast %cst_25 : f32 to vector<32x16xf32>
    %69 = arith.select %61, %67, %68 : vector<32x16xi1>, vector<32x16xf32>
    %70 = arith.addf %49, %69 : vector<32x16xf32>
    %cst_26 = arith.constant dense<0.000000e+00> : vector<32xf32>
    %71 = vector.multi_reduction <add>, %70, %cst_26 [1] : vector<32x16xf32> to vector<32xf32>
    %72 = vector.shape_cast %71 : vector<32xf32> to vector<32x1xf32>
    %73 = vector.broadcast %72 : vector<32x1xf32> to vector<32x16xf32>
    %74 = arith.divf %70, %73 : vector<32x16xf32>
    %c0_27 = arith.constant 0 : index
    %c0_28 = arith.constant 0 : index
    %c0_29 = arith.constant 0 : index
    %75 = vector.load %arg4[%c0_27, %c0_28, %c0_29] : memref<1x64x16xbf16, #tpu.memory_space<vmem>>, vector<1x64x16xbf16>
    %76 = vector.shape_cast %75 : vector<1x64x16xbf16> to vector<64x16xbf16>
    %77 = arith.truncf %74 : vector<32x16xf32> to vector<32x16xbf16>
    %cst_30 = arith.constant dense<0.000000e+00> : vector<64x32xf32>
    %78 = tpu.matmul %76, %77, %cst_30 {dimension_numbers = #tpu.dot_dimension_numbers<[1], [1], [0], [0], [0, 0, 1, 0], [], []>} : vector<64x16xbf16>, vector<32x16xbf16>, vector<64x32xf32> -> vector<64x32xf32>
    %c0_31 = arith.constant 0 : index
    %c0_32 = arith.constant 0 : index
    %c0_33 = arith.constant 0 : index
    %79 = vector.load %arg5[%c0_31, %c0_32, %c0_33] : memref<1x32x32xbf16, #tpu.memory_space<vmem>>, vector<1x32x32xbf16>
    %80 = vector.shape_cast %79 : vector<1x32x32xbf16> to vector<32x32xbf16>
    %c0_34 = arith.constant 0 : index
    %c0_35 = arith.constant 0 : index
    %81 = vector.load %arg6[%c0_34, %c0_35] : memref<32x32xbf16, #tpu.memory_space<vmem>>, vector<32x32xbf16>
    %cst_36 = arith.constant dense<0.000000e+00> : vector<32x32xf32>
    %82 = tpu.matmul %81, %80, %cst_36 {dimension_numbers = #tpu.dot_dimension_numbers<[1], [0], [0], [1], [0, 0, 1, 1], [], []>} : vector<32x32xbf16>, vector<32x32xbf16>, vector<32x32xf32> -> vector<32x32xf32>
    %c0_37 = arith.constant 0 : index
    %c0_38 = arith.constant 0 : index
    %83 = vector.load %arg7[%c0_37, %c0_38] : memref<32x64xbf16, #tpu.memory_space<vmem>>, vector<32x64xbf16>
    %84 = arith.truncf %78 : vector<64x32xf32> to vector<64x32xbf16>
    %cst_39 = arith.constant dense<0.000000e+00> : vector<32x32xf32>
    %85 = tpu.matmul %83, %84, %cst_39 {dimension_numbers = #tpu.dot_dimension_numbers<[1], [0], [0], [1], [0, 0, 1, 1], [], []>} : vector<32x64xbf16>, vector<64x32xbf16>, vector<32x32xf32> -> vector<32x32xf32>
    %86 = arith.addf %82, %85 : vector<32x32xf32>
    %c0_40 = arith.constant 0 : index
    %c0_41 = arith.constant 0 : index
    %87 = vector.load %arg8[%c0_40, %c0_41] : memref<32x1xf32, #tpu.memory_space<vmem>>, vector<32x1xf32>
    %88 = vector.broadcast %87 : vector<32x1xf32> to vector<32x32xf32>
    %89 = arith.addf %86, %88 : vector<32x32xf32>
    %cst_42 = arith.constant 0.000000e+00 : f32
    %90 = vector.broadcast %cst_42 : f32 to vector<32x32xf32>
    %91 = arith.maximumf %89, %90 : vector<32x32xf32>
    %92 = arith.truncf %91 : vector<32x32xf32> to vector<32x32xbf16>
    %c0_43 = arith.constant 0 : index
    %c0_44 = arith.constant 0 : index
    %93 = vector.load %arg9[%c0_43, %c0_44] : memref<32x32xbf16, #tpu.memory_space<vmem>>, vector<32x32xbf16>
    %c0_45 = arith.constant 0 : index
    %c0_46 = arith.constant 0 : index
    %94 = vector.load %arg10[%c0_45, %c0_46] : memref<32x1xf32, #tpu.memory_space<vmem>>, vector<32x1xf32>
    %cst_47 = arith.constant dense<0.000000e+00> : vector<32x32xf32>
    %95 = tpu.matmul %93, %92, %cst_47 {dimension_numbers = #tpu.dot_dimension_numbers<[1], [0], [0], [1], [0, 0, 1, 1], [], []>} : vector<32x32xbf16>, vector<32x32xbf16>, vector<32x32xf32> -> vector<32x32xf32>
    %96 = vector.broadcast %94 : vector<32x1xf32> to vector<32x32xf32>
    %97 = arith.addf %95, %96 : vector<32x32xf32>
    %cst_48 = arith.constant 0.000000e+00 : f32
    %98 = vector.broadcast %cst_48 : f32 to vector<32x32xf32>
    %99 = arith.maximumf %97, %98 : vector<32x32xf32>
    %100 = arith.truncf %99 : vector<32x32xf32> to vector<32x32xbf16>
    %c0_49 = arith.constant 0 : index
    %c0_50 = arith.constant 0 : index
    %c0_51 = arith.constant 0 : index
    %101 = vector.load %arg11[%c0_49, %c0_50, %c0_51] : memref<1x32x32xbf16, #tpu.memory_space<vmem>>, vector<1x32x32xbf16>
    %102 = vector.shape_cast %101 : vector<1x32x32xbf16> to vector<32x32xbf16>
    %103 = vector.shape_cast %100 : vector<32x32xbf16> to vector<1x32x32xbf16>
    tpu.vector_store %arg11[%c0_49, %c0_50, %c0_51], %103 {strides = array<i32>} : memref<1x32x32xbf16, #tpu.memory_space<vmem>>, vector<1x32x32xbf16>,
    return
  }
  func.func @transform_0(%arg0: i32, %arg1: i32) -> (i32, i32, i32) {
    %c0_i32 = arith.constant 0 : i32
    %c0_i32_0 = arith.constant 0 : i32
    return %arg0, %c0_i32, %arg1 : i32, i32, i32
  }
  func.func @transform_1(%arg0: i32, %arg1: i32) -> (i32, i32, i32) {
    %c0_i32 = arith.constant 0 : i32
    %c0_i32_0 = arith.constant 0 : i32
    %c0_i32_1 = arith.constant 0 : i32
    return %arg0, %c0_i32, %c0_i32_0 : i32, i32, i32
  }
  func.func @transform_2(%arg0: i32, %arg1: i32) -> (i32, i32, i32) {
    %c0_i32 = arith.constant 0 : i32
    %c0_i32_0 = arith.constant 0 : i32
    %c0_i32_1 = arith.constant 0 : i32
    return %arg0, %c0_i32, %c0_i32_0 : i32, i32, i32
  }
  func.func @transform_3(%arg0: i32, %arg1: i32) -> (i32, i32, i32) {
    %c0_i32 = arith.constant 0 : i32
    %c0_i32_0 = arith.constant 0 : i32
    return %arg0, %c0_i32, %arg1 : i32, i32, i32
  }
  func.func @transform_4(%arg0: i32, %arg1: i32) -> (i32, i32) {
    %c0_i32 = arith.constant 0 : i32
    %c0_i32_0 = arith.constant 0 : i32
    %c0_i32_1 = arith.constant 0 : i32
    return %c0_i32, %c0_i32_0 : i32, i32
  }
  func.func @transform_5(%arg0: i32, %arg1: i32) -> (i32, i32) {
    %c0_i32 = arith.constant 0 : i32
    %c0_i32_0 = arith.constant 0 : i32
    %c0_i32_1 = arith.constant 0 : i32
    return %c0_i32, %c0_i32_0 : i32, i32
  }
  func.func @transform_6(%arg0: i32, %arg1: i32) -> (i32, i32) {
    %c0_i32 = arith.constant 0 : i32
    %c0_i32_0 = arith.constant 0 : i32
    %c0_i32_1 = arith.constant 0 : i32
    return %c0_i32, %c0_i32_0 : i32, i32
  }
  func.func @transform_7(%arg0: i32, %arg1: i32) -> (i32, i32) {
    %c0_i32 = arith.constant 0 : i32
    %c0_i32_0 = arith.constant 0 : i32
    %c0_i32_1 = arith.constant 0 : i32
    return %c0_i32, %c0_i32_0 : i32, i32
  }
  func.func @transform_8(%arg0: i32, %arg1: i32) -> (i32, i32) {
    %c0_i32 = arith.constant 0 : i32
    %c0_i32_0 = arith.constant 0 : i32
    %c0_i32_1 = arith.constant 0 : i32
    return %c0_i32, %c0_i32_0 : i32, i32
  }
  func.func @transform_9(%arg0: i32, %arg1: i32) -> (i32, i32, i32) {
    %c0_i32 = arith.constant 0 : i32
    %c0_i32_0 = arith.constant 0 : i32
    return %arg0, %c0_i32, %arg1 : i32, i32, i32
  }
}

</mosaic_0001>

<bundles_post_ra>
// kernel: tpu_custom_call.1
= control target key start
LH: loop header
LB: loop body
LE: loop exit
PB: predicated region body
PF: predicated region fallthrough
CT: control target
= control target key end

     0   :  { %14 = vsyncpa [#allocation3], 0  ;;  %s2356_s0 = inlined_call_operand.vmem [shape: f32[2,8,32], index: 0, kind: input, shape index: {}]   ;;  %s2357_s1 = inlined_call_operand.vmem [shape: f32[2,8,16], index: 1, kind: input, shape index: {}]   ;;  %s2358_s2 = inlined_call_operand.vmem [shape: bf16[2,64,16], index: 2, kind: input, shape index: {}]   ;;  %s2359_s3 = inlined_call_operand.vmem [shape: bf16[2,32,32], index: 3, kind: input, shape index: {}]   ;;  %s2360_s4 = inlined_call_operand.vmem [shape: bf16[32,32], index: 4, kind: input, shape index: {}]   ;;  %s2361_s5 = inlined_call_operand.vmem [shape: bf16[32,64], index: 5, kind: input, shape index: {}]   ;;  %s2362_s6 = inlined_call_operand.vmem [shape: f32[32,1], index: 6, kind: input, shape index: {}]   ;;  %s2363_s7 = inlined_call_operand.vmem [shape: bf16[32,32], index: 7, kind: input, shape index: {}]   ;;  %s2364_s8 = inlined_call_operand.vmem [shape: f32[32,1], index: 8, kind: input, shape index: {}]   ;;  %s2365_s9 = inlined_call_operand.hbm [shape: bf16[2,32,32], index: 9, kind: output, shape index: {}]  }
   0x1   :  { %16 = vsyncpa [#allocation3 + $0x1], 0  ;;  %s1798_s30 = smov 0   ;;  %s1800_s10 = smov 0  }
   0x2   :  { %s1802_s11 = smov 0   ;;  %s1804_s12 = smov 0  }
   0x3   :  { %s1806_s13 = smov 0   ;;  %s1808_s14 = smov 0  }
   0x4 LB: > { %s1474_s15 = sadd.s32 4294967295, %s1743_s14   ;;  %s1475_s16 = sadd.s32 4294967294, %s1743_s14   ;;  %s1743_s14 = sphi %s1808_s14, %s22_s14   ;;  %s1739_s13 = sphi %s1806_s13, %s2392_s13   ;;  %s1735_s12 = sphi %s1804_s12, %s2391_s12   ;;  %s1731_s11 = sphi %s1802_s11, %s2390_s11   ;;  %s1727_s10 = sphi %s1800_s10, %s2389_s10   ;;  %s1723_s30 = sphi %s1798_s30, %s2388_s30  }
   0x5   : > { %s34_s17 = sadd.s32 1, %s1739_s13  ;;  %s256_s18 = sadd.s32 1, %s1731_s11 }
   0x6   : > { %p36_p0 = scmp.ge.s32.totalorder %s34_s17, 2  ;;  %p266_p1 = scmp.ne.s32.totalorder %s1731_s11, %s1727_s10 }
   0x7   : > { %p267_p2 = scmp.eq.s32.totalorder %s1474_s15, 1  ;;  %p272_p3 = scmp.ne.s32.totalorder %s1727_s10, %s1723_s30 }
   0x8   : > { %s2394_s17 = smov (%p36_p0, %s34_s17), 0  ;;  %p273_p5 = scmp.eq.s32.totalorder %s1475_s16, 1 }
   0x9   : > { %p1838_p4 = por %p267_p2, %p266_p1  ;;  %s251_s20 = ssub.s32 %s1739_s13, %s2394_s17 }
   0xa   : > { %p1478_p6 = scmp.ge.s32.totalorder %s1743_s14, 1  ;;  %p254_p7 = scmp.eq.s32.totalorder %s251_s20, 0 }
   0xb   : > { %p1845_p8 = por %p273_p5, %p272_p3  ;;  %p342_p9 = scmp.lt.s32.totalorder %s1743_s14, 3 }
   0xc   : > { %s1851_s22 = scalar_select %p254_p7, %s1731_s11, %s256_s18  }
   0xd   : > { %p343_p10 = pnand %p1478_p6, %p342_p9 }
   0xe   : > { %p397_p11 = scmp.lt.s32.totalorder (!%p343_p10), %s1735_s12, 1 }
   0xf   : > { %346 = sbr.rel (%p343_p10) target bundleno = 2107 (0x83b), region = 56 }
  0x14   : > { %s1855_s23 = scalar_select %p397_p11, %s1735_s12, 1  ;;  %vm456_vm0 = vcmask 64512   ;;  %vm504_vm1 = vcmask 130048   ;;  %v502_v18 = vlaneseq }
  0x16   : > { %s1480_s24 = sshll.u32 %s1855_s23, 3  ;;  %v1880_v19 = vand.u32 127, %v502_v18  ;;  %s1553_s16 = sshll.u32 %s1855_s23, 5 }
  0x17   : > { %s403_s27 = scalar_lea.vmem %s2356_s0, %s1480_s24  ;;  %s407_s15 = scalar_lea.vmem %s2357_s1, %s1480_s24 }
  0x18   : > { %v422_v0 = vld [vmem:[%s403_s27] sm:$0xff]  ;;  %s412_s24 = scalar_lea.vmem %s2358_s2, %s1553_s16  ;;  %s1554_s25 = sshll.u32 %s1855_s23, 4 }
  0x19   : > { %424 = vxpose.xlu0.b32.start.end [1/1] (short) (narrow) %v422_v0, 32  ;;  %v423_v1 = vld [vmem:[%s407_s15] sm:$0xff]  ;;  %s420_s28 = scalar_lea.vmem %s2359_s3, %s1554_s25  ;;  %s1567_s27 = sshll.u32 %s1735_s12, 4 }
  0x1a   : > { %484 = vmatpush.msra.mxu0 %v423_v1  ;;  %1568 = vmatpush.msra.mxu2 %v423_v1  ;;  %s1353_s15 = scalar_lea.hbm %s2365_s9, %s1567_s27 }
  0x1b   : > { %s1356_s16 = sshll.u32 %s1353_s15, 4  ;;  %s1357_s16 = int_to_ptr.hbm [resolvable:$true] %s1356_s16 }
  0x1c   : > { %s1679_s18 = sshra.s32 %s1357_s16, 4  ;;  %s1680_s18 = int_to_ptr.hbm [resolvable:$true] %s1679_s18 }
  0x1d   : > { %s1681_s20 = scalar_lea.hbm %s1680_s18, 16  ;;  %p1686_p1 = scmp.lt.s32.totalorder %s1680_s18, %s2365_s9 }
  0x1e   : > { %p1682_p12 = scmp.ne.s32.totalorder %s1680_s18, %s1681_s20 }
  0x20   : > { %p1683_p13 = pnand %p1682_p12, %p1838_p4 }
  0x22   : > { %p1684_p0 = pneg %p1683_p13 }
  0xbd   : > { %v440_v2 = vpop.trf.xlu0 }
  0xbe   : > { %1486 = vmatmul.msk.f32.vlgmr.msra.gmra.mxu0 %vm456_vm0, %v440_v2 }
  0xc5   : > { %v441_v3 = vpop.trf.xlu0 }
  0xc6   : > { %1487 = vmatmul.msk.f32.vlgmr.msra.gmra.mxu2 %vm456_vm0, %v441_v3 }
  0xcd   : > { %v442_v4 = vpop.trf.xlu0 }
  0xce   : > { %1488 = vmatmul.msk.f32.gmra.mxu2 %vm456_vm0, %v442_v4 }
  0xd5   : > { %v443_v5 = vpop.trf.xlu0 }
  0xd6   : > { %1489 = vmatmul.msk.f32.gmra.mxu2 %vm456_vm0, %v443_v5 }
 0x13b   : > { %v486_v15 = vpop.f32.mrf.mxu0 }
 0x13c   : > { %v1876_v16 = vmax.f32 %v486_v15, 0.0 }
 0x13e   : > { %v505_v17 = vsel %vm504_vm1, %v1876_v16, inf }
 0x149   : > { %v489_v6 = vpop.f32.mrf.mxu2 }
 0x14a   : > { %v1864_v7 = vmax.f32 %v489_v6, 0.0 }
 0x14c   : > { %v508_v8 = vsel %vm504_vm1, %v1864_v7, inf }
 0x14d   : > { %509 = vmin.xlane.f32.xlu2 %v508_v8 }
 0x151   : > { %v492_v9 = vpop.f32.mrf.mxu2 }
 0x152   : > { %v1868_v10 = vmax.f32 %v492_v9, 0.0 }
 0x154   : > { %v511_v11 = vsel %vm504_vm1, %v1868_v10, inf }
 0x155   : > { %512 = vmin.xlane.f32.xlu0 %v511_v11 }
 0x159   : > { %v495_v12 = vpop.f32.mrf.mxu2 }
 0x15a   : > { %v1872_v13 = vmax.f32 %v495_v12, 0.0 }
 0x15c   : > { %v514_v14 = vsel %vm504_vm1, %v1872_v13, inf }
 0x15d   : > { %515 = vmin.xlane.f32.xlu1 %v514_v14 }
 0x165   : > { %506 = vmin.xlane.f32.xlu1 %v505_v17 }
 0x1c0   : > { %v1888_v24 = vpop.xlane.xlu2 %509 }
 0x1c1   : > { %vm518_vm3 = vcmp.le.f32.partialorder %v1864_v7, %v1888_v24 }
 0x1c2   : > { %v522_v29 = vsel %vm518_vm3, %v1880_v19, 16 }
 0x1c3   : > { %v540_v32 = vsel %vm504_vm1, %v522_v29, 2147483647 }
 0x1c4   : > { %v542_v35 = vshra.s32 %v540_v32, 16  ;;  %v541_v48 = vand.u32 65535, %v540_v32 }
 0x1c6   : > { %v544_v38 = vcvt.s32.f32 %v542_v35  ;;  %v543_v52 = vcvt.s32.f32 %v541_v48 }
 0x1c8   : > { %v1882_v20 = vpop.xlane.xlu0 %512 }
 0x1c9   : > { %vm519_vm2 = vcmp.le.f32.partialorder %v1868_v10, %v1882_v20 }
 0x1ca   : > { %v523_v21 = vsel %vm519_vm2, %v1880_v19, 16 }
 0x1cb   : > { %v555_v22 = vsel %vm504_vm1, %v523_v21, 2147483647 }
 0x1cc   : > { %v557_v23 = vshra.s32 %v555_v22, 16  ;;  %v556_v40 = vand.u32 65535, %v555_v22 }
 0x1ce   : > { %v559_v25 = vcvt.s32.f32 %v557_v23  ;;  %v558_v42 = vcvt.s32.f32 %v556_v40 }
 0x1d0   : > { %v516_v26 = vpop.xlane.xlu1 %515  ;;  %560 = vmin.xlane.f32.xlu2 %v559_v25 }
 0x1d1   : > { %vm520_vm4 = vcmp.le.f32.partialorder %v1872_v13, %v516_v26  ;;  %v592_v56 = vadd.f32 1e-08, %v516_v26 }
 0x1d2   : > { %v524_v27 = vsel %vm520_vm4, %v1880_v19, 16 }
 0x1d3   : > { %v570_v28 = vsel %vm504_vm1, %v524_v27, 2147483647  ;;  %1633 = vrcp.f32 %v592_v56  ;;  %v649_v6 = vand.u32 2147483648, %v592_v56  ;;  %vm643_vm12 = vweird.f32 %v592_v56 }
 0x1d4   : > { %v572_v30 = vshra.s32 %v570_v28, 16  ;;  %v571_v44 = vand.u32 65535, %v570_v28  ;;  %v647_v9 = vand.u32 2147483647, %v592_v56 }
 0x1d5   : > { %v650_v17 = vor.u32 1.1754944e-38, %v649_v6 }
 0x1d6   : > { %v574_v31 = vcvt.s32.f32 %v572_v30  ;;  %v573_v46 = vcvt.s32.f32 %v571_v44  ;;  %vm648_vm14 = vcmp.eq.f32.partialorder %v647_v9, 8.507059e+37 }
 0x1d8   : > { %575 = vmin.xlane.f32.xlu1 %v574_v31  ;;  %v1897_v33 = vpop.xlane.xlu1 %506 }
 0x1d9   : > { %vm517_vm5 = vcmp.le.f32.partialorder %v1876_v16, %v1897_v33  ;;  %v1634_v57 = vpop.eup %1633 }
 0x1da   : > { %v521_v34 = vsel %vm517_vm5, %v1880_v19, 16  ;;  %v639_v58 = vmul.f32 %v1634_v57, %v592_v56  ;;  %vm644_vm11 = vweird.f32 %v1634_v57 }
 0x1db   : > { %v525_v36 = vsel %vm504_vm1, %v521_v34, 2147483647  ;;  %vm645_vm13 = vmor %vm643_vm12, %vm644_vm11 }
 0x1dc   : > { %v527_v37 = vshra.s32 %v525_v36, 16  ;;  %v526_v49 = vand.u32 65535, %v525_v36  ;;  %v640_v60 = vsub.f32 1.0, %v639_v58 }
 0x1de   : > { %v529_v39 = vcvt.s32.f32 %v527_v37  ;;  %v528_v53 = vcvt.s32.f32 %v526_v49  ;;  %v641_v0 = vmul.f32 %v1634_v57, %v640_v60 }
 0x1e0   : > { %545 = vmin.xlane.f32.xlu1 %v544_v38  ;;  %530 = vmin.xlane.f32.xlu2 %v529_v39  ;;  %v642_v4 = vadd.f32 %v1634_v57, %v641_v0 }
 0x1e2   : > { %v646_v14 = vsel %vm645_vm13, %v1634_v57, %v642_v4 }
 0x1e3   : > { %v651_v21 = vsel %vm648_vm14, %v650_v17, %v646_v14 }
 0x243   : > { %v561_v41 = vpop.xlane.xlu2 %560 }
 0x244   : > { %vm562_vm6 = vcmp.eq.f32.partialorder %v559_v25, %v561_v41  ;;  %v567_v59 = vcvt.f32.s32 %v561_v41 }
 0x245   : > { %v563_v43 = vsel %vm562_vm6, %v558_v42, inf }
 0x246   : > { %564 = vmin.xlane.f32.xlu2 %v563_v43  ;;  %v568_v62 = vshll.u32 %v567_v59, 16 }
 0x24b   : > { %v576_v45 = vpop.xlane.xlu1 %575 }
 0x24c   : > { %vm577_vm7 = vcmp.eq.f32.partialorder %v574_v31, %v576_v45  ;;  %v582_v2 = vcvt.f32.s32 %v576_v45 }
 0x24d   : > { %v578_v47 = vsel %vm577_vm7, %v573_v46, inf }
 0x24e   : > { %579 = vmin.xlane.f32.xlu1 %v578_v47  ;;  %v583_v11 = vshll.u32 %v582_v2, 16 }
 0x253   : > { %v546_v50 = vpop.xlane.xlu1 %545  ;;  %v531_v51 = vpop.xlane.xlu2 %530 }
 0x254   : > { %vm547_vm8 = vcmp.eq.f32.partialorder %v544_v38, %v546_v50  ;;  %vm532_vm9 = vcmp.eq.f32.partialorder %v529_v39, %v531_v51  ;;  %v552_v18 = vcvt.f32.s32 %v546_v50 }
 0x255   : > { %v548_v54 = vsel %vm547_vm8, %v543_v52, inf  ;;  %v533_v55 = vsel %vm532_vm9, %v528_v53, inf }
 0x256   : > { %549 = vmin.xlane.f32.xlu1 %v548_v54  ;;  %534 = vmin.xlane.f32.xlu2 %v533_v55  ;;  %v553_v28 = vshll.u32 %v552_v18, 16 }
 0x2b9   : > { %v565_v61 = vpop.xlane.xlu2 %564 }
 0x2ba   : > { %v566_v63 = vcvt.f32.s32 %v565_v61 }
 0x2bc   : > { %v1903_v1 = vadd.s32 %v568_v62, %v566_v63 }
 0x2be   : > { %vm587_vm10 = vcmp.eq.s32.totalorder %v1880_v19, %v1903_v1 }
 0x2bf   : > { %v1911_v3 = vsel %vm587_vm10, 1e+30, %v1868_v10  ;;  %v537_v10 = vcvt.f32.s32 %v531_v51 }
 0x2c0   : > { %v671_v5 = vsel %vm504_vm1, %v1911_v3, inf }
 0x2c1   : > { %v580_v8 = vpop.xlane.xlu1 %579  ;;  %672 = vmin.xlane.f32.xlu2 %v671_v5  ;;  %v538_v29 = vshll.u32 %v537_v10, 16 }
 0x2c2   : > { %v581_v12 = vcvt.f32.s32 %v580_v8 }
 0x2c4   : > { %v584_v15 = vadd.s32 %v583_v11, %v581_v12  ;;  %v591_v12 = vadd.f32 1e-08, %v1882_v20 }
 0x2c6   : > { %vm588_vm15 = vcmp.eq.s32.totalorder %v1880_v19, %v584_v15  ;;  %1635 = vrcp.f32 %v591_v12  ;;  %v1976_v15 = vadd.f32 1e-08, %v1888_v24  ;;  %vm628_vm14 = vweird.f32 %v591_v12 }
 0x2c7   : > { %v1917_v22 = vsel %vm588_vm15, 1e+30, %v1872_v13  ;;  %v1919_v23 = vsel %vm588_vm15, %v651_v21, 0.0  ;;  %v1984_v21 = vadd.f32 1e-08, %v1897_v33 }
 0x2c8   : > { %v674_v25 = vsel %vm504_vm1, %v1917_v22, inf  ;;  %vm613_vm15 = vweird.f32 %v1976_v15 }
 0x2c9   : > { %675 = vmin.xlane.f32.xlu1 %v674_v25  ;;  %v550_v26 = vpop.xlane.xlu1 %549  ;;  %v535_v27 = vpop.xlane.xlu2 %534 }
 0x2ca   : > { %v551_v30 = vcvt.f32.s32 %v550_v26  ;;  %v536_v31 = vcvt.f32.s32 %v535_v27 }
 0x2cc   : > { %v1923_v32 = vadd.s32 %v553_v28, %v551_v30  ;;  %v1925_v34 = vadd.s32 %v538_v29, %v536_v31  ;;  %v1636_v18 = vpop.eup %1635 }
 0x2cd   : > { %v624_v25 = vmul.f32 %v1636_v18, %v591_v12  ;;  %vm629_vm12 = vweird.f32 %v1636_v18 }
 0x2ce   : > { %vm586_vm0 = vcmp.eq.s32.totalorder %v1880_v19, %v1923_v32  ;;  %vm585_vm2 = vcmp.eq.s32.totalorder %v1880_v19, %v1925_v34 }
 0x2cf   : > { %v1935_v13 = vsel %vm586_vm0, 1e+30, %v1864_v7  ;;  %v1941_v35 = vsel %vm585_vm2, 1e+30, %v1876_v16  ;;  %v625_v24 = vsub.f32 1.0, %v624_v25 }
 0x2d0   : > { %v668_v36 = vsel %vm504_vm1, %v1935_v13, inf  ;;  %v665_v37 = vsel %vm504_vm1, %v1941_v35, inf }
 0x2d1   : > { %669 = vmin.xlane.f32.xlu1 %v668_v36  ;;  %666 = vmin.xlane.f32.xlu2 %v665_v37  ;;  %v626_v31 = vmul.f32 %v1636_v18, %v625_v24 }
 0x334   : > { %v673_v38 = vpop.xlane.xlu2 %672 }
 0x335   : > { %vm679_vm3 = vcmp.le.f32.partialorder %v1911_v3, %v673_v38  ;;  %v1972_v14 = vadd.f32 1e-08, %v673_v38 }
 0x336   : > { %v683_v7 = vsel %vm679_vm3, %v1880_v19, 16  ;;  %vm2020_vm3 = vmor %vm628_vm14, %vm629_vm12 }
 0x337   : > { %v715_v39 = vsel %vm504_vm1, %v683_v7, 2147483647  ;;  %1637 = vrcp.f32 %v1972_v14 }
 0x338   : > { %v717_v40 = vshra.s32 %v715_v39, 16  ;;  %v716_v56 = vand.u32 65535, %v715_v39  ;;  %1639 = vrcp.f32 %v1976_v15  ;;  %v632_v39 = vand.u32 2147483647, %v591_v12 }
 0x33a   : > { %v719_v41 = vcvt.s32.f32 %v717_v40  ;;  %v718_v58 = vcvt.s32.f32 %v716_v56 }
 0x33c   : > { %v676_v42 = vpop.xlane.xlu1 %675  ;;  %720 = vmin.xlane.f32.xlu2 %v719_v41 }
 0x33d   : > { %vm680_vm4 = vcmp.le.f32.partialorder %v1917_v22, %v676_v42  ;;  %v1978_v17 = vadd.f32 1e-08, %v676_v42  ;;  %v1981_v10 = vpop.eup %1637  ;;  %v634_v42 = vand.u32 2147483648, %v591_v12 }
 0x33e   : > { %v684_v16 = vsel %vm680_vm4, %v1880_v19, 16  ;;  %v784_v20 = vmul.f32 %v1981_v10, %v1972_v14  ;;  %v1989_v26 = vpop.eup %1639  ;;  %vm789_vm13 = vweird.f32 %v1981_v10 }
 0x33f   : > { %v730_v43 = vsel %vm504_vm1, %v684_v16, 2147483647  ;;  %1641 = vrcp.f32 %v1978_v17  ;;  %v609_v33 = vmul.f32 %v1989_v26, %v1976_v15  ;;  %vm614_vm4 = vweird.f32 %v1989_v26 }
 0x340   : > { %v732_v44 = vshra.s32 %v730_v43, 16  ;;  %v731_v60 = vand.u32 65535, %v730_v43  ;;  %1643 = vrcp.f32 %v1984_v21  ;;  %v785_v28 = vsub.f32 1.0, %v784_v20 }
 0x341   : > { %v610_v7 = vsub.f32 1.0, %v609_v33  ;;  %vm803_vm12 = vweird.f32 %v1978_v17 }
 0x342   : > { %v734_v45 = vcvt.s32.f32 %v732_v44  ;;  %v733_v62 = vcvt.s32.f32 %v731_v60  ;;  %v786_v38 = vmul.f32 %v1981_v10, %v785_v28 }
 0x344   : > { %735 = vmin.xlane.f32.xlu1 %v734_v45  ;;  %v670_v46 = vpop.xlane.xlu1 %669  ;;  %v667_v47 = vpop.xlane.xlu2 %666  ;;  %v787_v44 = vadd.f32 %v1981_v10, %v786_v38 }
 0x345   : > { %vm678_vm5 = vcmp.le.f32.partialorder %v1935_v13, %v670_v46  ;;  %vm677_vm6 = vcmp.le.f32.partialorder %v1941_v35, %v667_v47  ;;  %v1992_v27 = vadd.f32 1e-08, %v670_v46  ;;  %v1994_v29 = vadd.f32 1e-08, %v667_v47  ;;  %v1996_v30 = vpop.eup %1641 }
 0x346   : > { %v682_v48 = vsel %vm678_vm5, %v1880_v19, 16  ;;  %v681_v49 = vsel %vm677_vm6, %v1880_v19, 16  ;;  %v2001_v36 = vpop.eup %1643  ;;  %v799_v37 = vmul.f32 %v1996_v30, %v1978_v17  ;;  %v611_v46 = vmul.f32 %v1989_v26, %v610_v7 }
 0x347   : > { %v700_v50 = vsel %vm504_vm1, %v682_v48, 2147483647  ;;  %v685_v51 = vsel %vm504_vm1, %v681_v49, 2147483647  ;;  %1645 = vrcp.f32 %v1992_v27  ;;  %v594_v40 = vmul.f32 %v2001_v36, %v1984_v21 }
 0x348   : > { %v702_v52 = vshra.s32 %v700_v50, 16  ;;  %v687_v53 = vshra.s32 %v685_v51, 16  ;;  %v701_v0 = vand.u32 65535, %v700_v50  ;;  %v686_v2 = vand.u32 65535, %v685_v51 }
 0x349   : > { %1647 = vrcp.f32 %v1994_v29  ;;  %v800_v16 = vsub.f32 1.0, %v799_v37  ;;  %v617_v47 = vand.u32 2147483647, %v1976_v15  ;;  %v794_v48 = vand.u32 2147483648, %v1972_v14 }
 0x34a   : > { %v704_v54 = vcvt.s32.f32 %v702_v52  ;;  %v689_v55 = vcvt.s32.f32 %v687_v53  ;;  %v703_v6 = vcvt.s32.f32 %v701_v0  ;;  %v688_v8 = vcvt.s32.f32 %v686_v2 }
 0x34b   : > { %v619_v51 = vand.u32 2147483648, %v1976_v15  ;;  %vm788_vm5 = vweird.f32 %v1972_v14  ;;  %v792_v52 = vand.u32 2147483647, %v1972_v14  ;;  %v595_v53 = vsub.f32 1.0, %v594_v40 }
 0x34c   : > { %705 = vmin.xlane.f32.xlu1 %v704_v54  ;;  %690 = vmin.xlane.f32.xlu2 %v689_v55  ;;  %vm633_vm6 = vcmp.eq.f32.partialorder %v632_v39, 8.507059e+37  ;;  %v807_v37 = vand.u32 2147483647, %v1978_v17 }
 0x34d   : > { %v596_v14 = vmul.f32 %v2001_v36, %v595_v53 }
 0x34f   : > { %v597_v7 = vadd.f32 %v2001_v36, %v596_v14 }
 0x3af   : > { %v1959_v57 = vpop.xlane.xlu2 %720 }
 0x3b0   : > { %vm722_vm7 = vcmp.eq.f32.partialorder %v719_v41, %v1959_v57  ;;  %v627_v41 = vadd.f32 %v1636_v18, %v626_v31  ;;  %v727_v43 = vcvt.f32.s32 %v1959_v57  ;;  %v779_v57 = vand.u32 2147483648, %v1992_v27 }
 0x3b1   : > { %v723_v59 = vsel %vm722_vm7, %v718_v58, inf  ;;  %vm2032_vm7 = vmor %vm788_vm5, %vm789_vm13  ;;  %vm599_vm13 = vweird.f32 %v2001_v36 }
 0x3b2   : > { %724 = vmin.xlane.f32.xlu2 %v723_v59  ;;  %v728_v58 = vshll.u32 %v727_v43, 16  ;;  %v791_v60 = vsel %vm2032_vm7, %v1981_v10, %v787_v44  ;;  %v809_v10 = vand.u32 2147483648, %v1978_v17  ;;  %vm773_vm7 = vweird.f32 %v1992_v27 }
 0x3b4   : > { %v810_v43 = vor.u32 1.1754944e-38, %v809_v10 }
 0x3b7   : > { %v1962_v61 = vpop.xlane.xlu1 %735 }
 0x3b8   : > { %vm737_vm8 = vcmp.eq.f32.partialorder %v734_v45, %v1962_v61  ;;  %v2012_v45 = vpop.eup %1645  ;;  %v742_v25 = vcvt.f32.s32 %v1962_v61 }
 0x3b9   : > { %v738_v63 = vsel %vm737_vm8, %v733_v62, inf  ;;  %v2018_v49 = vpop.eup %1647  ;;  %v801_v62 = vmul.f32 %v1996_v30, %v800_v16  ;;  %v769_v0 = vmul.f32 %v2012_v45, %v1992_v27  ;;  %vm793_vm8 = vcmp.eq.f32.partialorder %v792_v52, 8.507059e+37 }
 0x3ba   : > { %739 = vmin.xlane.f32.xlu1 %v738_v63  ;;  %v2041_v63 = vadd.f32 %v1989_v26, %v611_v46  ;;  %v754_v2 = vmul.f32 %v2018_v49, %v1994_v29 }
 0x3bb   : > { %v802_v20 = vadd.f32 %v1996_v30, %v801_v62  ;;  %v770_v24 = vsub.f32 1.0, %v769_v0  ;;  %v777_v62 = vand.u32 2147483647, %v1992_v27 }
 0x3bc   : > { %v755_v28 = vsub.f32 1.0, %v754_v2 }
 0x3bd   : > { %v771_v44 = vmul.f32 %v2012_v45, %v770_v24 }
 0x3be   : > { %v756_v46 = vmul.f32 %v2018_v49, %v755_v28 }
 0x3bf   : > { %v1965_v4 = vpop.xlane.xlu1 %705  ;;  %v1967_v5 = vpop.xlane.xlu2 %690 }
 0x3c0   : > { %vm707_vm9 = vcmp.eq.f32.partialorder %v704_v54, %v1965_v4  ;;  %vm692_vm11 = vcmp.eq.f32.partialorder %v689_v55, %v1967_v5  ;;  %v631_v54 = vsel %vm2020_vm3, %v1636_v18, %v627_v41  ;;  %v635_v55 = vor.u32 1.1754944e-38, %v634_v42 }
 0x3c1   : > { %v708_v9 = vsel %vm707_vm9, %v703_v6, inf  ;;  %v693_v11 = vsel %vm692_vm11, %v688_v8, inf  ;;  %v795_v6 = vor.u32 1.1754944e-38, %v794_v48  ;;  %vm804_vm11 = vweird.f32 %v1996_v30 }
 0x3c2   : > { %709 = vmin.xlane.f32.xlu1 %v708_v9  ;;  %694 = vmin.xlane.f32.xlu2 %v693_v11  ;;  %v636_v8 = vsel %vm633_vm6, %v635_v55, %v631_v54  ;;  %v602_v9 = vand.u32 2147483647, %v1984_v21  ;;  %vm2078_vm14 = vmor %vm803_vm12, %vm804_vm11  ;;  %v743_v41 = vshll.u32 %v742_v25, 16  ;;  %vm598_vm3 = vweird.f32 %v1984_v21 }
 0x3c3   : > { %v655_v12 = vsel %vm587_vm10, %v636_v8, 0.0  ;;  %v796_v18 = vsel %vm793_vm8, %v795_v6, %v791_v60  ;;  %vm2064_vm10 = vmor %vm613_vm15, %vm614_vm4  ;;  %vm2086_vm15 = vcmp.eq.f32.partialorder %v617_v47, 8.507059e+37  ;;  %v806_v16 = vsel %vm2078_vm14, %v1996_v30, %v802_v20 }
 0x3c4   : > { %v616_v17 = vsel %vm2064_vm10, %v1989_v26, %v2041_v63  ;;  %vm2096_vm4 = vmor %vm598_vm3, %vm599_vm13  ;;  %vm2100_vm5 = vcmp.eq.f32.partialorder %v602_v9, 8.507059e+37  ;;  %v604_v47 = vand.u32 2147483648, %v1984_v21  ;;  %vm808_vm6 = vcmp.eq.f32.partialorder %v807_v37, 8.507059e+37 }
 0x3c5   : > { %v601_v30 = vsel %vm2096_vm4, %v2001_v36, %v597_v7  ;;  %vm774_vm8 = vweird.f32 %v2012_v45  ;;  %v712_v52 = vcvt.f32.s32 %v1965_v4  ;;  %v697_v53 = vcvt.f32.s32 %v1967_v5 }
 0x3c6   : > { %vm759_vm11 = vweird.f32 %v2018_v49  ;;  %v772_v55 = vadd.f32 %v2012_v45, %v771_v44  ;;  %v757_v36 = vadd.f32 %v2018_v49, %v756_v46  ;;  %v605_v5 = vor.u32 1.1754944e-38, %v604_v47  ;;  %vm2127_vm10 = vmor %vm773_vm7, %vm774_vm8 }
 0x3c7   : > { %vm758_vm12 = vweird.f32 %v1994_v29  ;;  %v762_v63 = vand.u32 2147483647, %v1994_v29  ;;  %v698_v0 = vshll.u32 %v697_v53, 16  ;;  %vm778_vm14 = vcmp.eq.f32.partialorder %v777_v62, 8.507059e+37 }
 0x3c8   : > { %vm2136_vm13 = vmor %vm758_vm12, %vm759_vm11  ;;  %v606_v27 = vsel %vm2100_vm5, %v605_v5, %v601_v30 }
 0x3c9   : > { %v653_v20 = vsel %vm585_vm2, %v606_v27, 0.0 }
 0x425   : > { %v725_v56 = vpop.xlane.xlu2 %724 }
 0x426   : > { %v726_v59 = vcvt.f32.s32 %v725_v56 }
 0x428   : > { %v729_v11 = vadd.s32 %v728_v58, %v726_v59  ;;  %v764_v58 = vand.u32 2147483648, %v1994_v29  ;;  %v776_v29 = vsel %vm2127_vm10, %v2012_v45, %v772_v55 }
 0x42a   : > { %vm747_vm9 = vcmp.eq.s32.totalorder %v1880_v19, %v729_v11  ;;  %v761_v11 = vsel %vm2136_vm13, %v2018_v49, %v757_v36  ;;  %v765_v10 = vor.u32 1.1754944e-38, %v764_v58 }
 0x42b   : > { %v2058_v33 = vsel %vm747_vm9, 1e+30, %v1911_v3  ;;  %v815_v1 = vsel %vm747_vm9, %v796_v18, 0.0  ;;  %v620_v3 = vor.u32 1.1754944e-38, %v619_v51  ;;  %v811_v51 = vsel %vm808_vm6, %v810_v43, %v806_v16 }
 0x42c   : > { %v831_v61 = vsel %vm504_vm1, %v2058_v33, inf  ;;  %v2072_v38 = vadd.f32 %v815_v1, %v655_v12  ;;  %v780_v18 = vor.u32 1.1754944e-38, %v779_v57 }
 0x42d   : > { %v740_v39 = vpop.xlane.xlu1 %739  ;;  %832 = vmin.xlane.f32.xlu2 %v831_v61  ;;  %v621_v9 = vsel %vm2086_vm15, %v620_v3, %v616_v17  ;;  %vm763_vm15 = vcmp.eq.f32.partialorder %v762_v63, 8.507059e+37 }
 0x42e   : > { %v741_v42 = vcvt.f32.s32 %v740_v39  ;;  %v654_v25 = vsel %vm586_vm0, %v621_v9, 0.0  ;;  %v781_v45 = vsel %vm778_vm14, %v780_v18, %v776_v29  ;;  %v766_v49 = vsel %vm763_vm15, %v765_v10, %v761_v11 }
 0x430   : > { %v744_v50 = vadd.s32 %v743_v41, %v741_v42 }
 0x432   : > { %vm748_vm9 = vcmp.eq.s32.totalorder %v1880_v19, %v744_v50 }
 0x433   : > { %v824_v21 = vsel %vm748_vm9, 1e+30, %v1917_v22  ;;  %v816_v54 = vsel %vm748_vm9, %v811_v51, 0.0 }
 0x434   : > { %v834_v56 = vsel %vm504_vm1, %v824_v21, inf  ;;  %v2121_v4 = vadd.f32 %v816_v54, %v1919_v23  ;;  %v713_v23 = vshll.u32 %v712_v52, 16 }
 0x435   : > { %835 = vmin.xlane.f32.xlu1 %v834_v56  ;;  %v710_v59 = vpop.xlane.xlu1 %709  ;;  %v695_v60 = vpop.xlane.xlu2 %694 }
 0x436   : > { %v711_v2 = vcvt.f32.s32 %v710_v59  ;;  %v696_v6 = vcvt.f32.s32 %v695_v60 }
 0x438   : > { %v714_v12 = vadd.s32 %v713_v23, %v711_v2  ;;  %v699_v14 = vadd.s32 %v698_v0, %v696_v6 }
 0x43a   : > { %vm746_vm3 = vcmp.eq.s32.totalorder %v1880_v19, %v714_v12  ;;  %vm745_vm4 = vcmp.eq.s32.totalorder %v1880_v19, %v699_v14 }
 0x43b   : > { %v822_v24 = vsel %vm746_vm3, 1e+30, %v1935_v13  ;;  %v814_v28 = vsel %vm746_vm3, %v781_v45, 0.0  ;;  %v821_v1 = vsel %vm745_vm4, 1e+30, %v1941_v35  ;;  %v813_v31 = vsel %vm745_vm4, %v766_v49, 0.0 }
 0x43c   : > { %v828_v32 = vsel %vm504_vm1, %v822_v24, inf  ;;  %v825_v61 = vsel %vm504_vm1, %v821_v1, inf  ;;  %v2162_v34 = vadd.f32 %v814_v28, %v654_v25  ;;  %v2164_v37 = vadd.f32 %v813_v31, %v653_v20 }
 0x43d   : > { %829 = vmin.xlane.f32.xlu1 %v828_v32  ;;  %826 = vmin.xlane.f32.xlu2 %v825_v61 }
 0x4a0   : > { %v833_v3 = vpop.xlane.xlu2 %832 }
 0x4a1   : > { %vm839_vm0 = vcmp.le.f32.partialorder %v2058_v33, %v833_v3  ;;  %v911_v23 = vadd.f32 1e-08, %v833_v3 }
 0x4a2   : > { %v843_v7 = vsel %vm839_vm0, %v1880_v19, 16 }
 0x4a3   : > { %v875_v13 = vsel %vm504_vm1, %v843_v7, 2147483647  ;;  %1649 = vrcp.f32 %v911_v23  ;;  %v954_v45 = vand.u32 2147483648, %v911_v23  ;;  %vm948_vm12 = vweird.f32 %v911_v23 }
 0x4a4   : > { %v877_v39 = vshra.s32 %v875_v13, 16  ;;  %v876_v51 = vand.u32 65535, %v875_v13 }
 0x4a5   : > { %v955_v13 = vor.u32 1.1754944e-38, %v954_v45 }
 0x4a6   : > { %v879_v35 = vcvt.s32.f32 %v877_v39  ;;  %v878_v53 = vcvt.s32.f32 %v876_v51 }
 0x4a8   : > { %v836_v15 = vpop.xlane.xlu1 %835  ;;  %880 = vmin.xlane.f32.xlu2 %v879_v35 }
 0x4a9   : > { %vm840_vm2 = vcmp.le.f32.partialorder %v824_v21, %v836_v15  ;;  %v912_v0 = vadd.f32 1e-08, %v836_v15  ;;  %v1650_v2 = vpop.eup %1649 }
 0x4aa   : > { %v844_v17 = vsel %vm840_vm2, %v1880_v19, 16  ;;  %v944_v6 = vmul.f32 %v1650_v2, %v911_v23  ;;  %vm949_vm10 = vweird.f32 %v1650_v2 }
 0x4ab   : > { %v890_v40 = vsel %vm504_vm1, %v844_v17, 2147483647  ;;  %1651 = vrcp.f32 %v912_v0  ;;  %vm950_vm13 = vmor %vm948_vm12, %vm949_vm10  ;;  %vm963_vm4 = vweird.f32 %v912_v0 }
 0x4ac   : > { %v892_v41 = vshra.s32 %v890_v40, 16  ;;  %v891_v54 = vand.u32 65535, %v890_v40  ;;  %v945_v27 = vsub.f32 1.0, %v944_v6 }
 0x4ae   : > { %v894_v42 = vcvt.s32.f32 %v892_v41  ;;  %v893_v36 = vcvt.s32.f32 %v891_v54  ;;  %v946_v12 = vmul.f32 %v1650_v2, %v945_v27 }
 0x4b0   : > { %895 = vmin.xlane.f32.xlu1 %v894_v42  ;;  %v830_v16 = vpop.xlane.xlu1 %829  ;;  %v827_v43 = vpop.xlane.xlu2 %826  ;;  %v947_v25 = vadd.f32 %v1650_v2, %v946_v12 }
 0x4b1   : > { %vm838_vm5 = vcmp.le.f32.partialorder %v822_v24, %v830_v16  ;;  %vm837_vm6 = vcmp.le.f32.partialorder %v821_v1, %v827_v43  ;;  %v2184_v8 = vadd.f32 1e-08, %v830_v16  ;;  %v2186_v9 = vadd.f32 1e-08, %v827_v43  ;;  %v1652_v29 = vpop.eup %1651 }
 0x4b2   : > { %v842_v33 = vsel %vm838_vm5, %v1880_v19, 16  ;;  %v841_v44 = vsel %vm837_vm6, %v1880_v19, 16  ;;  %v959_v11 = vmul.f32 %v1652_v29, %v912_v0  ;;  %v952_v24 = vand.u32 2147483647, %v911_v23 }
 0x4b3   : > { %v860_v46 = vsel %vm504_vm1, %v842_v33, 2147483647  ;;  %v845_v48 = vsel %vm504_vm1, %v841_v44, 2147483647  ;;  %1653 = vrcp.f32 %v2184_v8  ;;  %v951_v61 = vsel %vm950_vm13, %v1650_v2, %v947_v25 }
 0x4b4   : > { %v862_v26 = vshra.s32 %v860_v46, 16  ;;  %v847_v47 = vshra.s32 %v845_v48, 16  ;;  %v861_v57 = vand.u32 65535, %v860_v46  ;;  %v846_v58 = vand.u32 65535, %v845_v48 }
 0x4b5   : > { %1655 = vrcp.f32 %v2186_v9  ;;  %v960_v10 = vsub.f32 1.0, %v959_v11  ;;  %vm953_vm14 = vcmp.eq.f32.partialorder %v952_v24, 8.507059e+37  ;;  %vm964_vm3 = vweird.f32 %v1652_v29 }
 0x4b6   : > { %v864_v50 = vcvt.s32.f32 %v862_v26  ;;  %v849_v30 = vcvt.s32.f32 %v847_v47  ;;  %v863_v60 = vcvt.s32.f32 %v861_v57  ;;  %v848_v22 = vcvt.s32.f32 %v846_v58  ;;  %vm965_vm0 = vmor %vm963_vm4, %vm964_vm3 }
 0x4b7   : > { %v961_v3 = vmul.f32 %v1652_v29, %v960_v10  ;;  %v969_v16 = vand.u32 2147483648, %v912_v0  ;;  %v967_v33 = vand.u32 2147483647, %v912_v0  ;;  %v924_v57 = vand.u32 2147483648, %v2186_v9 }
 0x4b8   : > { %865 = vmin.xlane.f32.xlu1 %v864_v50  ;;  %850 = vmin.xlane.f32.xlu2 %v849_v30 }
 0x4b9   : > { %v2190_v18 = vpop.eup %1653  ;;  %v962_v41 = vadd.f32 %v1652_v29, %v961_v3  ;;  %v970_v51 = vor.u32 1.1754944e-38, %v969_v16  ;;  %vm968_vm2 = vcmp.eq.f32.partialorder %v967_v33, 8.507059e+37 }
 0x4ba   : > { %v929_v31 = vmul.f32 %v2190_v18, %v2184_v8  ;;  %vm934_vm6 = vweird.f32 %v2190_v18 }
 0x4bb   : > { %v2192_v20 = vpop.eup %1655  ;;  %v966_v26 = vsel %vm965_vm0, %v1652_v29, %v962_v41 }
 0x4bc   : > { %v914_v32 = vmul.f32 %v2192_v20, %v2186_v9  ;;  %v930_v15 = vsub.f32 1.0, %v929_v31 }
 0x4be   : > { %v915_v17 = vsub.f32 1.0, %v914_v32  ;;  %v931_v47 = vmul.f32 %v2190_v18, %v930_v15 }
 0x4c0   : > { %v932_v54 = vadd.f32 %v2190_v18, %v931_v47 }
 0x51b   : > { %v881_v52 = vpop.xlane.xlu2 %880 }
 0x51c   : > { %vm882_vm7 = vcmp.eq.f32.partialorder %v879_v35, %v881_v52  ;;  %v887_v14 = vcvt.f32.s32 %v881_v52  ;;  %v956_v35 = vsel %vm953_vm14, %v955_v13, %v951_v61 }
 0x51d   : > { %v883_v21 = vsel %vm882_vm7, %v878_v53, inf  ;;  %v971_v53 = vsel %vm968_vm2, %v970_v51, %v966_v26  ;;  %vm919_vm7 = vweird.f32 %v2192_v20 }
 0x51e   : > { %884 = vmin.xlane.f32.xlu2 %v883_v21  ;;  %v888_v28 = vshll.u32 %v887_v14, 16 }
 0x523   : > { %v2175_v55 = vpop.xlane.xlu1 %895 }
 0x524   : > { %vm897_vm8 = vcmp.eq.f32.partialorder %v894_v42, %v2175_v55  ;;  %v902_v39 = vcvt.f32.s32 %v2175_v55 }
 0x525   : > { %v898_v56 = vsel %vm897_vm8, %v893_v36, inf  ;;  %vm933_vm8 = vweird.f32 %v2184_v8 }
 0x526   : > { %899 = vmin.xlane.f32.xlu1 %v898_v56  ;;  %v903_v44 = vshll.u32 %v902_v39, 16  ;;  %v939_v56 = vand.u32 2147483648, %v2184_v8 }
 0x528   : > { %v940_v29 = vor.u32 1.1754944e-38, %v939_v56 }
 0x52b   : > { %v2178_v5 = vpop.xlane.xlu1 %865  ;;  %v2180_v59 = vpop.xlane.xlu2 %850 }
 0x52c   : > { %vm867_vm9 = vcmp.eq.f32.partialorder %v864_v50, %v2178_v5  ;;  %vm852_vm11 = vcmp.eq.f32.partialorder %v849_v30, %v2180_v59  ;;  %v916_v50 = vmul.f32 %v2192_v20, %v915_v17  ;;  %v857_v52 = vcvt.f32.s32 %v2180_v59 }
 0x52d   : > { %v868_v62 = vsel %vm867_vm9, %v863_v60, inf  ;;  %v853_v63 = vsel %vm852_vm11, %v848_v22, inf  ;;  %vm2220_vm9 = vmor %vm933_vm8, %vm934_vm6  ;;  %v937_v22 = vand.u32 2147483647, %v2184_v8  ;;  %vm918_vm11 = vweird.f32 %v2186_v9 }
 0x52e   : > { %869 = vmin.xlane.f32.xlu1 %v868_v62  ;;  %854 = vmin.xlane.f32.xlu2 %v853_v63  ;;  %v917_v55 = vadd.f32 %v2192_v20, %v916_v50  ;;  %v858_v62 = vshll.u32 %v857_v52, 16  ;;  %vm920_vm10 = vmor %vm918_vm11, %vm919_vm7  ;;  %v936_v2 = vsel %vm2220_vm9, %v2190_v18, %v932_v54 }
 0x52f   : > { %vm938_vm12 = vcmp.eq.f32.partialorder %v937_v22, 8.507059e+37 }
 0x530   : > { %v921_v6 = vsel %vm920_vm10, %v2192_v20, %v917_v55  ;;  %v941_v11 = vsel %vm938_vm12, %v940_v29, %v936_v2  ;;  %v1556_v29 = vld [vmem:[%s412_s24 + $0x8] sm:$0xff] }
 0x591   : > { %v885_v49 = vpop.xlane.xlu2 %884 }
 0x592   : > { %v886_v1 = vcvt.f32.s32 %v885_v49 }
 0x594   : > { %v889_v7 = vadd.s32 %v888_v28, %v886_v1 }
 0x596   : > { %vm907_vm15 = vcmp.eq.s32.totalorder %v1880_v19, %v889_v7 }
 0x597   : > { %v975_v40 = vsel %vm907_vm15, %v956_v35, 0.0 }
 0x598   : > { %v2201_v42 = vadd.f32 %v975_v40, %v2072_v38  ;;  %v872_v38 = vcvt.f32.s32 %v2178_v5 }
 0x599   : > { %v900_v43 = vpop.xlane.xlu1 %899 }
 0x59a   : > { %v901_v46 = vcvt.f32.s32 %v900_v43  ;;  %v987_v48 = vsel %vm504_vm1, %v2201_v42, 0.0  ;;  %v873_v58 = vshll.u32 %v872_v38, 16 }
 0x59b   : > { %988 = vadd.xlane.f32.xlu2 %v987_v48 }
 0x59c   : > { %v904_v30 = vadd.s32 %v903_v44, %v901_v46 }
 0x59e   : > { %vm908_vm5 = vcmp.eq.s32.totalorder %v1880_v19, %v904_v30 }
 0x59f   : > { %v976_v21 = vsel %vm908_vm5, %v971_v53, 0.0 }
 0x5a0   : > { %v2215_v36 = vadd.f32 %v976_v21, %v2121_v4  ;;  %v922_v4 = vand.u32 2147483647, %v2186_v9  ;;  %v925_v9 = vor.u32 1.1754944e-38, %v924_v57 }
 0x5a1   : > { %v870_v5 = vpop.xlane.xlu1 %869  ;;  %v855_v59 = vpop.xlane.xlu2 %854 }
 0x5a2   : > { %v871_v63 = vcvt.f32.s32 %v870_v5  ;;  %v856_v23 = vcvt.f32.s32 %v855_v59  ;;  %v990_v0 = vsel %vm504_vm1, %v2215_v36, 0.0  ;;  %vm923_vm13 = vcmp.eq.f32.partialorder %v922_v4, 8.507059e+37 }
 0x5a3   : > { %991 = vadd.xlane.f32.xlu1 %v990_v0  ;;  %v926_v12 = vsel %vm923_vm13, %v925_v9, %v921_v6  ;;  %v1557_v9 = vld [vmem:[%s412_s24 + $0x10] sm:$0xff] }
 0x5a4   : > { %v874_v8 = vadd.s32 %v873_v58, %v871_v63  ;;  %v859_v27 = vadd.s32 %v858_v62, %v856_v23 }
 0x5a6   : > { %vm906_vm14 = vcmp.eq.s32.totalorder %v1880_v19, %v874_v8  ;;  %vm905_vm15 = vcmp.eq.s32.totalorder %v1880_v19, %v859_v27  ;;  %v1555_v8 = vld [vmem:[%s412_s24] sm:$0xff]  ;;  %v1558_v27 = vld [vmem:[%s412_s24 + $0x18] sm:$0xff]  ;;  %s394_s24 = sand.u32 1, %s1727_s10  }
 0x5a7   : > { %v974_v14 = vsel %vm906_vm14, %v941_v11, 0.0  ;;  %v973_v10 = vsel %vm905_vm15, %v926_v12, 0.0  ;;  %s1479_s25 = sshll.u32 %s394_s24, 4  ;;  %s1341_s12 = scalar_lea.sflag [#allocation3], %s394_s24 }
 0x5a8   : > { %v2238_v25 = vadd.f32 %v974_v14, %v2162_v34  ;;  %v2241_v18 = vadd.f32 %v973_v10, %v2164_v37  ;;  %v1560_v10 = vld [vmem:[%s420_s28 + $0x8] sm:$0xff]  ;;  %s396_s26 = scalar_lea.vmem [#allocation2], %s1479_s25 }
 0x5a9   : > { %s1354_s23 = sshll.u32 %s396_s26, 4  ;;  %s1355_s23 = int_to_ptr.vmem [resolvable:$true] %s1354_s23 }
 0x5aa   : > { %v984_v20 = vsel %vm504_vm1, %v2238_v25, 0.0  ;;  %v981_v45 = vsel %vm504_vm1, %v2241_v18, 0.0 }
 0x5ab   : > { %985 = vadd.xlane.f32.xlu0 %v984_v20  ;;  %982 = vadd.xlane.f32.xlu2 %v981_v45 }
 0x60e   : > { %v989_v49 = vpop.xlane.xlu2 %988 }
 0x60f   : > { %1657 = vrcp.f32 %v989_v49  ;;  %v1034_v7 = vand.u32 2147483648, %v989_v49  ;;  %vm1028_vm4 = vweird.f32 %v989_v49  ;;  %v1032_v39 = vand.u32 2147483647, %v989_v49 }
 0x611   : > { %v1035_v41 = vor.u32 1.1754944e-38, %v1034_v7  ;;  %vm1033_vm6 = vcmp.eq.f32.partialorder %v1032_v39, 8.507059e+37  ;;  %v1268_v7 = vld [vmem:[%s2364_s8] sm:$0xff] }
 0x615   : > { %v1658_v19 = vpop.eup %1657 }
 0x616   : > { %v1024_v24 = vmul.f32 %v1658_v19, %v989_v49  ;;  %v992_v28 = vpop.xlane.xlu1 %991  ;;  %vm1029_vm3 = vweird.f32 %v1658_v19  ;;  %v1561_v49 = vld [vmem:[%s2360_s4] sm:$0xff] }
 0x617   : > { %1659 = vrcp.f32 %v992_v28  ;;  %vm1030_vm0 = vmor %vm1028_vm4, %vm1029_vm3  ;;  %v1049_v35 = vand.u32 2147483648, %v992_v28  ;;  %v1047_v40 = vand.u32 2147483647, %v992_v28  ;;  %vm1043_vm5 = vweird.f32 %v992_v28 }
 0x618   : > { %v1025_v1 = vsub.f32 1.0, %v1024_v24  ;;  %v1562_v24 = vld [vmem:[%s2360_s4 + $0x8] sm:$0xff]  ;;  %vm1156_vm4 = vcmask 523264  }
 0x619   : > { %v1050_v33 = vor.u32 1.1754944e-38, %v1049_v35  ;;  %vm1048_vm8 = vcmp.eq.f32.partialorder %v1047_v40, 8.507059e+37  ;;  %v1563_v35 = vld [vmem:[%s2361_s5] sm:$0xff]  ;;  %v1271_v40 = vld [vmem:[%s2364_s8 + $0x18] sm:$0xff] }
 0x61a   : > { %v1026_v34 = vmul.f32 %v1658_v19, %v1025_v1  ;;  %v1230_v1 = vld [vmem:[%s2362_s6] sm:$0xff] }
 0x61c   : > { %v1027_v3 = vadd.f32 %v1658_v19, %v1026_v34  ;;  %v1232_v34 = vld [vmem:[%s2362_s6 + $0x10] sm:$0xff] }
 0x61d   : > { %v1660_v31 = vpop.eup %1659 }
 0x61e   : > { %v1039_v37 = vmul.f32 %v1660_v31, %v992_v28  ;;  %v983_v32 = vpop.xlane.xlu2 %982  ;;  %v986_v61 = vpop.xlane.xlu0 %985  ;;  %vm1044_vm2 = vweird.f32 %v1660_v31  ;;  %v1031_v17 = vsel %vm1030_vm0, %v1658_v19, %v1027_v3  ;;  %vm1335_vm0 = vcmask 257024  }
 0x61f   : > { %1661 = vrcp.f32 %v983_v32  ;;  %vm1045_vm7 = vmor %vm1043_vm5, %vm1044_vm2  ;;  %v1036_v44 = vsel %vm1033_vm6, %v1035_v41, %v1031_v17  ;;  %v1004_v52 = vand.u32 2147483648, %v983_v32  ;;  %v1019_v21 = vand.u32 2147483648, %v986_v61  ;;  %v1269_v17 = vld [vmem:[%s2364_s8 + $0x8] sm:$0xff] }
 0x620   : > { %v1040_v13 = vsub.f32 1.0, %v1039_v37  ;;  %1663 = vrcp.f32 %v986_v61  ;;  %v1037_v51 = vmul.f32 %v1036_v44, %v2201_v42  ;;  %v1002_v56 = vand.u32 2147483647, %v983_v32  ;;  %v1233_v37 = vld [vmem:[%s2362_s6 + $0x18] sm:$0xff]  ;;  %v1564_v41 = vld [vmem:[%s2361_s5 + $0x8] sm:$0xff] }
 0x621   : > { %v1017_v58 = vand.u32 2147483647, %v986_v61  ;;  %vm998_vm10 = vweird.f32 %v983_v32  ;;  %v1005_v60 = vor.u32 1.1754944e-38, %v1004_v52  ;;  %vm1013_vm13 = vweird.f32 %v986_v61 }
 0x622   : > { %v1041_v15 = vmul.f32 %v1660_v31, %v1040_v13  ;;  %vm1003_vm15 = vcmp.eq.f32.partialorder %v1002_v56, 8.507059e+37  ;;  %v1231_v13 = vld [vmem:[%s2362_s6 + $0x8] sm:$0xff] }
 0x623   : > { %vm1018_vm3 = vcmp.eq.f32.partialorder %v1017_v58, 8.507059e+37 }
 0x624   : > { %v1042_v16 = vadd.f32 %v1660_v31, %v1041_v15  ;;  %v1270_v15 = vld [vmem:[%s2364_s8 + $0x10] sm:$0xff] }
 0x625   : > { %v1662_v43 = vpop.eup %1661 }
 0x626   : > { %v1664_v46 = vpop.eup %1663  ;;  %v994_v48 = vmul.f32 %v1662_v43, %v983_v32  ;;  %v1046_v26 = vsel %vm1045_vm7, %v1660_v31, %v1042_v16  ;;  %vm999_vm9 = vweird.f32 %v1662_v43  ;;  %v1745_v31 = vmov 0  }
 0x627   : > { %v1009_v47 = vmul.f32 %v1664_v46, %v986_v61  ;;  %v1051_v50 = vsel %vm1048_vm8, %v1050_v33, %v1046_v26  ;;  %vm1014_vm11 = vweird.f32 %v1664_v46  ;;  %vm1000_vm12 = vmor %vm998_vm10, %vm999_vm9  ;;  %1632 = vset.pattern.permute.xlu0 %v1745_v31  ;;  %1630 = vset.pattern.permute.xlu1 %v1745_v31 }
 0x628   : > { %v995_v30 = vsub.f32 1.0, %v994_v48  ;;  %v1052_v38 = vmul.f32 %v1051_v50, %v2215_v36  ;;  %vm1015_vm14 = vmor %vm1013_vm13, %vm1014_vm11  ;;  %v1020_v36 = vor.u32 1.1754944e-38, %v1019_v21  ;;  %1236 = vperm.xlu0 %1632, %v1230_v1   ;;  %1246 = vperm.xlu1 %1630, %v1232_v34  }
 0x629   : > { %v1010_v53 = vsub.f32 1.0, %v1009_v47  ;;  %1631 = vset.pattern.permute.xlu2 %v1745_v31 }
 0x62a   : > { %v996_v54 = vmul.f32 %v1662_v43, %v995_v30  ;;  %v1062_v55 = vpack.c.bf16 %v1052_v38, %v1037_v51  ;;  %1251 = vperm.xlu2 %1631, %v1233_v37  }
 0x62b   : > { %v1011_v57 = vmul.f32 %v1664_v46, %v1010_v53 }
 0x62c   : > { %v1099_v5 = vsel %vm504_vm1, %v1062_v55, 0  ;;  %v997_v59 = vadd.f32 %v1662_v43, %v996_v54 }
 0x62d   : > { %1107 = vmatpush.bf16.xpose.msra.mxu1 %v1099_v5  ;;  %1569 = vmatpush.bf16.xpose.msra.mxu3 %v1099_v5  ;;  %v1012_v42 = vadd.f32 %v1664_v46, %v1011_v57 }
 0x62e   : > { %v1001_v22 = vsel %vm1000_vm12, %v1662_v43, %v997_v59 }
 0x62f   : > { %v1006_v4 = vsel %vm1003_vm15, %v1005_v60, %v1001_v22  ;;  %v1016_v62 = vsel %vm1015_vm14, %v1664_v46, %v1012_v42 }
 0x630   : > { %v1007_v63 = vmul.f32 %v1006_v4, %v2241_v18  ;;  %v1021_v23 = vsel %vm1018_vm3, %v1020_v36, %v1016_v62  ;;  %v1559_v18 = vld [vmem:[%s420_s28] sm:$0xff]  ;;  %1274 = vperm.xlu1 %1630, %v1268_v7   ;;  %v1566_v62 = vld [vmem:[%s2363_s7 + $0x8] sm:$0xff]  ;;  %s1685_s28 = scalar_lea.hbm %s2365_s9, 32 }
 0x631   : > { %v1022_v0 = vmul.f32 %v1021_v23, %v2238_v25  ;;  %v1565_v4 = vld [vmem:[%s2363_s7] sm:$0xff]  ;;  %p1687_p2 = scmp.lt.s32.totalorder %s1685_s28, %s1681_s20 }
 0x632   : > { %1241 = vperm.xlu2 %1631, %v1231_v13  }
 0x633   : > { %v1061_v2 = vpack.c.bf16 %v1022_v0, %v1007_v63  ;;  %p1688_p3 = por %p1687_p2, %p1686_p1 }
 0x635   : > { %v1096_v6 = vsel %vm504_vm1, %v1061_v2, 0  ;;  %p1689_p5 = pnand %p1688_p3, %p1684_p0 }
 0x636   : > { %1108 = vmatpush.bf16.xpose.msra.mxu1 %v1096_v6  ;;  %1570 = vmatpush.bf16.xpose.msra.mxu3 %v1096_v6 }
 0x638   : > { %1284 = vperm.xlu1 %1630, %v1270_v15  }
 0x63a   : > { %1279 = vperm.xlu2 %1631, %v1269_v17  }
 0x63d   : > { %1506 = vmatmul.msk.bf16.vlgmr.msra.gmra.mxu1 %vm504_vm1, %v1555_v8  ;;  %1509 = vmatmul.msk.bf16.vlgmr.msra.gmra.mxu3 %vm504_vm1, %v1558_v27 }
 0x63e   : > { %1217 = vmatpush.bf16.msrb.mxu3 %v1560_v10 }
 0x642   : > { %1218 = vmatpush.bf16.msrb.mxu3 %v1559_v18  ;;  %1289 = vperm.xlu2 %1631, %v1271_v40  }
 0x64d   : > { %1507 = vmatmul.msk.bf16.gmra.mxu1 %vm504_vm1, %v1556_v29 }
 0x65d   : > { %1508 = vmatmul.msk.bf16.gmra.mxu1 %vm504_vm1, %v1557_v9  ;;  %vm1204_vm1 = vcmask 261120  }
 0x65e   : > { %1536 = vmatmul.msk.bf16.vlgmr.msrb.gmra.mxu3 %vm1204_vm1, %v1561_v49 }
 0x66e   : > { %1537 = vmatmul.msk.bf16.gmra.mxu3 %vm1204_vm1, %v1562_v24 }
 0x684   : > { %v1252_v48 = vpop.permute.xlu2 %1251 }
 0x68c   : > { %v1242_v55 = vpop.permute.xlu2 %1241 }
 0x694   : > { %v1280_v8 = vpop.permute.xlu2 %1279 }
 0x69a   : > { %v1247_v30 = vpop.permute.xlu1 %1246  ;;  %v1237_v54 = vpop.permute.xlu0 %1236 }
 0x6a2   : > { %v1275_v63 = vpop.permute.xlu1 %1274 }
 0x6ba   : > { %v1110_v11 = vpop.f32.mrf.mxu1 }
 0x6c0   : > { %v1125_v12 = vpop.f32.mrf.mxu3 }
 0x6c2   : > { %v1112_v14 = vpop.f32.mrf.mxu1 }
 0x6c3   : > { %v1142_v39 = vpack.c.bf16 %v1112_v14, %v1110_v11 }
 0x6c8   : > { %v1127_v25 = vpop.f32.mrf.mxu3 }
 0x6c9   : > { %v1145_v20 = vpack.c.bf16 %v1127_v25, %v1125_v12  ;;  %v1285_v12 = vpop.permute.xlu1 %1284 }
 0x6ca   : > { %v1115_v45 = vpop.f32.mrf.mxu1 }
 0x6cb   : > { %1167 = vmatpush.bf16.msrb.mxu2 %v1145_v20  ;;  %v1290_v20 = vpop.permute.xlu2 %1289 }
 0x6d2   : > { %v1117_v19 = vpop.f32.mrf.mxu1 }
 0x6d3   : > { %v1143_v3 = vpack.c.bf16 %v1117_v19, %v1115_v45 }
 0x6da   : > { %v1120_v28 = vpop.f32.mrf.mxu1 }
 0x6e1   : > { %v1220_v16 = vpop.f32.mrf.mxu3 }
 0x6e2   : > { %v1122_v32 = vpop.f32.mrf.mxu1 }
 0x6e3   : > { %v1144_v61 = vpack.c.bf16 %v1122_v32, %v1120_v28 }
 0x6e5   : > { %1168 = vmatpush.bf16.msrb.mxu2 %v1144_v61 }
 0x6e9   : > { %1169 = vmatpush.bf16.msrb.mxu2 %v1143_v3  ;;  %v1222_v33 = vpop.f32.mrf.mxu3 }
 0x6ed   : > { %1170 = vmatpush.bf16.msrb.mxu2 %v1142_v39 }
 0x6f0   : > { %1518 = vmatmul.msk.bf16.vlgmr.msrb.gmra.mxu2 %vm1156_vm4, %v1563_v35 }
 0x6f1   : > { %v1225_v46 = vpop.f32.mrf.mxu3 }
 0x6f9   : > { %v1227_v51 = vpop.f32.mrf.mxu3 }
 0x700   : > { %1519 = vmatmul.msk.bf16.gmra.mxu2 %vm1156_vm4, %v1564_v41 }
 0x773   : > { %v1172_v43 = vpop.f32.mrf.mxu2 }
 0x774   : > { %v1221_v52 = vadd.f32 %v1220_v16, %v1172_v43 }
 0x776   : > { %v1254_v58 = vadd.f32 %v1237_v54, %v1221_v52 }
 0x778   : > { %v1258_v36 = vmax.f32 %v1254_v58, 0.0 }
 0x77b   : > { %v1174_v44 = vpop.f32.mrf.mxu2 }
 0x77c   : > { %v1223_v50 = vadd.f32 %v1222_v33, %v1174_v44 }
 0x77e   : > { %v1255_v56 = vadd.f32 %v1242_v55, %v1223_v50 }
 0x780   : > { %v1259_v60 = vmax.f32 %v1255_v56, 0.0 }
 0x782   : > { %v1262_v22 = vpack.c.bf16 %v1259_v60, %v1258_v36 }
 0x783   : > { %v1177_v26 = vpop.f32.mrf.mxu2 }
 0x784   : > { %v1226_v47 = vadd.f32 %v1225_v46, %v1177_v26 }
 0x786   : > { %v1256_v53 = vadd.f32 %v1247_v30, %v1226_v47 }
 0x788   : > { %v1260_v5 = vmax.f32 %v1256_v53, 0.0 }
 0x78b   : > { %v1179_v38 = vpop.f32.mrf.mxu2 }
 0x78c   : > { %v1228_v21 = vadd.f32 %v1227_v51, %v1179_v38 }
 0x78e   : > { %v1257_v57 = vadd.f32 %v1252_v48, %v1228_v21 }
 0x790   : > { %v1261_v59 = vmax.f32 %v1257_v57, 0.0 }
 0x792   : > { %v1263_v42 = vpack.c.bf16 %v1261_v59, %v1260_v5 }
 0x794   : > { %1314 = vmatpush.bf16.msrb.mxu0 %v1263_v42 }
 0x798   : > { %1315 = vmatpush.bf16.msrb.mxu0 %v1262_v22 }
 0x79b   : > { %1546 = vmatmul.msk.bf16.vlgmr.msrb.gmra.mxu0 %vm1204_vm1, %v1565_v4 }
 0x7ab   : > { %1547 = vmatmul.msk.bf16.gmra.mxu0 %vm1204_vm1, %v1566_v62 }
 0x818   : > { %v1317_v23 = vpop.f32.mrf.mxu0 }
 0x819   : > { %v1318_v0 = vadd.f32 %v1317_v23, %v1275_v63 }
 0x81b   : > { %v1327_v2 = vmax.f32 %v1318_v0, 0.0 }
 0x81d   : > { %v1331_v6 = vpack.c.bf16 %v1327_v2, %v1327_v2 }
 0x81f   : > { %1336 = vst.msk [vmem:[%s396_s26] sm:$0xf] %vm1335_vm0, %v1331_v6 }
 0x820   : > { %v1319_v27 = vpop.f32.mrf.mxu0 }
 0x821   : > { %v1320_v29 = vadd.f32 %v1319_v27, %v1280_v8 }
 0x823   : > { %v1328_v9 = vmax.f32 %v1320_v29, 0.0 }
 0x825   : > { %v1332_v11 = vpack.c.bf16 %v1328_v9, %v1328_v9 }
 0x827   : > { %1337 = vst.msk [vmem:[%s396_s26 + $0x4] sm:$0xf] %vm1335_vm0, %v1332_v11 }
 0x828   : > { %v1322_v14 = vpop.f32.mrf.mxu0 }
 0x829   : > { %v1323_v10 = vadd.f32 %v1322_v14, %v1285_v12 }
 0x82b   : > { %v1329_v25 = vmax.f32 %v1323_v10, 0.0 }
 0x82d   : > { %v1333_v18 = vpack.c.bf16 %v1329_v25, %v1329_v25 }
 0x82f   : > { %1338 = vst.msk [vmem:[%s396_s26 + $0x8] sm:$0xf] %vm1335_vm0, %v1333_v18 }
 0x830   : > { %v1324_v45 = vpop.f32.mrf.mxu0 }
 0x831   : > { %v1325_v49 = vadd.f32 %v1324_v45, %v1290_v20 }
 0x833   : > { %v1330_v19 = vmax.f32 %v1325_v49, 0.0 }
 0x835   : > { %v1334_v24 = vpack.c.bf16 %v1330_v19, %v1330_v19 }
 0x837   : > { %1339 = vst.msk [vmem:[%s396_s26 + $0xc] sm:$0xf] %vm1335_vm0, %v1334_v24 }
 0x838   : > { %1692 = shalt.err (!%p1689_p5)
}
 0x839   : > { %s1746_s24 = smov 64   ;;  %s1747_s26 = smov 4  }
 0x83a   : > { %1571 = dma.vmem_to_hbm [thread:$0]  (%p1838_p4), %s1355_s23, 256, %s1357_s16, %s1341_s12, %s1746_s24, %s1746_s24, %s1747_s26  }
 0x83b PF: > { %p1577_p6 = scmp.ge.s32.totalorder %s1743_s14, 2  ;;  %s1371_s25 = sand.u32 1, %s1723_s30  }
 0x83c   : > { %s1372_s27 = scalar_lea.sflag [#allocation3], %s1371_s25 }
 0x83d   : > { %p1574_p7 = pnand %p1577_p6, %p1845_p8 }
 0x83f   : > { %p1575_p9 = pneg %p1574_p7 }
 0x841   : > { %1718 = dma.done.wait (%p1575_p9), %s1372_s27, 256  }
 0x842   : > { %1720 = vsyncadd (%p1575_p9), %s1372_s27, 4294967040  ;;  %s22_s14 = sadd.s32 1, %s1743_s14   ;;  %s2388_s30 = smov %s1727_s10 }
 0x843   : > { %p19_p10 = scmp.ge.s32.totalorder %s22_s14, 4   ;;  %s2389_s10 = smov %s1731_s11 }
 0x844   : > { %s2390_s11 = smov %s1851_s22  ;;  %s2391_s12 = smov %s1739_s13 }
 0x845   : > { %s2392_s13 = smov %s2394_s17  ;;  %21 = sbr.rel (!%p19_p10) target bundleno = 4 (0x4), region = 100 }
 0x84a   :  { %1378 = vsyncpa [#allocation3], 1 }
 0x84b   :  { %1380 = vsyncpa [#allocation3 + $0x1], 1 }

</bundles_post_ra>
